<compile_context>
chip_gen: v5e
topology: v5e:2x2
jax: 0.10.0
libtpu: 0.0.40
codegen_flags: <defaults>
</compile_context>

<pallas_src>
import functools
import math

import jax
import jax.numpy as jnp
from jax.experimental import pallas as pl
from jax.experimental.pallas import tpu as pltpu


# -----------------------------------------------------------------------------
# Helpers
# -----------------------------------------------------------------------------
_SQRT_2_OVER_PI = 0.7978845608028654


def _gelu_new(x):
    # "new GELU" (tanh approximation), as used by nanoGPT / agilerl EvolvableMLP.
    return 0.5 * x * (1.0 + jnp.tanh(_SQRT_2_OVER_PI * (x + 0.044715 * (x * x * x))))


# -----------------------------------------------------------------------------
# LayerNorm kernel
# -----------------------------------------------------------------------------
def _layer_norm_kernel(x_ref, w_ref, *rest, eps, has_bias):
    if has_bias:
        b_ref, o_ref = rest
    else:
        (o_ref,) = rest
    x = x_ref[...].astype(jnp.float32)
    mean = jnp.mean(x, axis=-1, keepdims=True)
    xc = x - mean
    var = jnp.mean(xc * xc, axis=-1, keepdims=True)      # biased variance (torch semantics)
    y = xc * jax.lax.rsqrt(var + eps)
    y = y * w_ref[...].astype(jnp.float32)
    if has_bias:
        y = y + b_ref[...].astype(jnp.float32)
    o_ref[...] = y.astype(o_ref.dtype)


def layer_norm(x, weight, bias=None, eps=1e-5):
    """LayerNorm over the last dim of x. No padding copies; ragged last block is masked."""
    orig_shape = x.shape
    D = orig_shape[-1]
    x2 = x.reshape(-1, D)
    R = x2.shape[0]
    itemsize = jnp.dtype(x2.dtype).itemsize

    # Large row tiles (~2 MiB input block) so per-grid-step overhead is amortized.
    target_bytes = 2 * 1024 * 1024
    tm = max(8, (target_bytes // max(D * itemsize, 1)) // 8 * 8)
    tm = min(tm, 1024)
    if tm >= R:
        tm = R                                  # full-extent block (always legal)
    grid = (pl.cdiv(R, tm),)                    # no jnp.pad / out[:R] round trips

    in_specs = [
        pl.BlockSpec((tm, D), lambda i: (i, 0)),
        pl.BlockSpec((1, D), lambda i: (0, 0)),
    ]
    args = [x2, weight.reshape(1, D)]
    has_bias = bias is not None
    if has_bias:
        in_specs.append(pl.BlockSpec((1, D), lambda i: (0, 0)))
        args.append(bias.reshape(1, D))

    # input + output double-buffered + fp32 intermediates + params + headroom
    needed = (4 * itemsize + 16) * tm * D + 8 * D * itemsize + (1 << 21)
    vmem_limit = int(min(48 * 1024 * 1024, max(16 * 1024 * 1024, needed)))

    out = pl.pallas_call(
        functools.partial(_layer_norm_kernel, eps=eps, has_bias=has_bias),
        out_shape=jax.ShapeDtypeStruct((R, D), x.dtype),
        grid_spec=pltpu.PrefetchScalarGridSpec(
            num_scalar_prefetch=0,
            grid=grid,
            in_specs=in_specs,
            out_specs=pl.BlockSpec((tm, D), lambda i: (i, 0)),
        ),
        compiler_params=pltpu.CompilerParams(
            dimension_semantics=("parallel",),
            vmem_limit_bytes=vmem_limit,
        ),
    )(*args)
    return out.reshape(orig_shape)


# -----------------------------------------------------------------------------
# Linear (x @ W^T + b) kernel with optional fused NewGELU
# -----------------------------------------------------------------------------
def _linear_kernel(x_ref, w_ref, *rest, has_bias, activation):
    if has_bias:
        b_ref, o_ref, acc_ref = rest
    else:
        o_ref, acc_ref = rest

    k = pl.program_id(2)

    @pl.when(k == 0)
    def _init():
        acc_ref[...] = jnp.zeros_like(acc_ref)

    acc_ref[...] += jnp.dot(x_ref[...], w_ref[...],
                            preferred_element_type=jnp.float32)

    @pl.when(k == pl.num_programs(2) - 1)
    def _finalize():
        y = acc_ref[...]
        if has_bias:
            y = y + b_ref[...].astype(jnp.float32)
        if activation == "gelu_new":
            y = _gelu_new(y)
        o_ref[...] = y.astype(o_ref.dtype)


def linear(x, w_t, b=None, activation=None):
    """y = x @ w_t (+ b) (+ activation). x: (..., K); w_t: (K, N) (already transposed)."""
    orig_shape = x.shape
    K = orig_shape[-1]
    K2, N = w_t.shape
    assert K == K2
    x2 = x.reshape(-1, K)
    M = x2.shape[0]

    tm = M if M <= 256 else 256
    tn = N if N <= 512 else 512
    # Keep the reduction axis un-tiled unless it divides cleanly (avoids relying on
    # the contents of OOB reads feeding the accumulation).
    if K <= 2048:
        tk = K
    elif K % 512 == 0:
        tk = 512
    elif K % 256 == 0:
        tk = 256
    else:
        tk = K
    nk = K // tk

    grid = (pl.cdiv(M, tm), pl.cdiv(N, tn), nk)

    in_specs = [
        pl.BlockSpec((tm, tk), lambda i, j, kk: (i, kk)),
        pl.BlockSpec((tk, tn), lambda i, j, kk: (kk, j)),
    ]
    args = [x2, w_t]
    has_bias = b is not None
    if has_bias:
        in_specs.append(pl.BlockSpec((1, tn), lambda i, j, kk: (0, j)))
        args.append(b.reshape(1, N))

    itemsize = jnp.dtype(x2.dtype).itemsize
    needed = (2 * tm * tk + 2 * tk * tn + 2 * tm * tn) * itemsize + 4 * tm * tn + (1 << 21)
    vmem_limit = int(min(48 * 1024 * 1024, max(16 * 1024 * 1024, needed)))

    out = pl.pallas_call(
        functools.partial(_linear_kernel, has_bias=has_bias, activation=activation),
        out_shape=jax.ShapeDtypeStruct((M, N), x.dtype),
        grid_spec=pltpu.PrefetchScalarGridSpec(
            num_scalar_prefetch=0,
            grid=grid,
            in_specs=in_specs,
            out_specs=pl.BlockSpec((tm, tn), lambda i, j, kk: (i, j)),
            scratch_shapes=[pltpu.VMEM((tm, tn), jnp.float32)],
        ),
        compiler_params=pltpu.CompilerParams(
            dimension_semantics=("parallel", "parallel", "arbitrary"),
            vmem_limit_bytes=vmem_limit,
        ),
    )(*args)
    return out.reshape(orig_shape[:-1] + (N,))


# -----------------------------------------------------------------------------
# Causal self-attention kernel (one (batch, head) per grid step, full T block)
# -----------------------------------------------------------------------------
def _causal_attn_kernel(q_ref, k_ref, v_ref, o_ref, *, scale):
    q = q_ref[...].astype(jnp.float32)    # (T, Dh)
    k = k_ref[...].astype(jnp.float32)
    v = v_ref[...].astype(jnp.float32)

    # scores = q @ k^T * scale
    s = jax.lax.dot_general(q, k, (((1,), (1,)), ((), ())),
                            preferred_element_type=jnp.float32) * scale
    T = s.shape[0]
    row = jax.lax.broadcasted_iota(jnp.int32, (T, T), 0)
    col = jax.lax.broadcasted_iota(jnp.int32, (T, T), 1)
    s = jnp.where(col <= row, s, -1e30)

    m = jnp.max(s, axis=-1, keepdims=True)
    p = jnp.exp(s - m)
    denom = jnp.sum(p, axis=-1, keepdims=True)
    att = p / denom
    y = jnp.dot(att, v, preferred_element_type=jnp.float32)
    o_ref[...] = y.astype(o_ref.dtype)


def causal_attention(q, k, v):
    """q, k, v: (B, H, T, Dh) -> (B, H, T, Dh), causal softmax attention."""
    B, H, T, Dh = q.shape
    scale = 1.0 / math.sqrt(Dh)

    def spec():
        return pl.BlockSpec((None, None, T, Dh), lambda b, h: (b, h, 0, 0))

    return pl.pallas_call(
        functools.partial(_causal_attn_kernel, scale=scale),
        out_shape=jax.ShapeDtypeStruct((B, H, T, Dh), q.dtype),
        grid_spec=pltpu.PrefetchScalarGridSpec(
            num_scalar_prefetch=0,
            grid=(B, H),
            in_specs=[spec(), spec(), spec()],
            out_specs=spec(),
        ),
        compiler_params=pltpu.CompilerParams(
            dimension_semantics=("parallel", "parallel"),
        ),
    )(q, k, v)


# -----------------------------------------------------------------------------
# Block forward (Pallas) and pure-JAX reference
# -----------------------------------------------------------------------------
def block_forward(x, p, n_head, eps):
    B, T, C = x.shape
    hd = C // n_head

    # ln_1 -> c_attn -> split heads -> causal attention -> merge heads -> c_proj
    h = layer_norm(x, p["ln1_w"], p["ln1_b"], eps)
    qkv = linear(h, p["attn_w"].T, p["attn_b"])                # (B, T, 3C)
    q, k, v = jnp.split(qkv, 3, axis=-1)
    q = q.reshape(B, T, n_head, hd).transpose(0, 2, 1, 3)
    k = k.reshape(B, T, n_head, hd).transpose(0, 2, 1, 3)
    v = v.reshape(B, T, n_head, hd).transpose(0, 2, 1, 3)
    present = (k, v)

    y = causal_attention(q, k, v)                              # (B, H, T, hd)
    y = y.transpose(0, 2, 1, 3).reshape(B, T, C)
    attn_out = linear(y, p["proj_w"].T, p["proj_b"])
    x = x + attn_out

    # ln_2 -> MLP (Linear -> NewGELU -> Linear -> NewGELU, per EvolvableMLP output_activation)
    h2 = layer_norm(x, p["ln2_w"], p["ln2_b"], eps)
    m = linear(h2, p["fc_w"].T, p["fc_b"], activation="gelu_new")
    m = linear(m, p["out_w"].T, p["out_b"], activation="gelu_new")
    x = x + m
    return x, present


def reference_block_forward(x, p, n_head, eps):
    def ln(t, w, b):
        mu = jnp.mean(t, axis=-1, keepdims=True)
        var = jnp.mean((t - mu) ** 2, axis=-1, keepdims=True)
        y = (t - mu) / jnp.sqrt(var + eps) * w
        return y + b if b is not None else y

    B, T, C = x.shape
    hd = C // n_head
    h = ln(x, p["ln1_w"], p["ln1_b"])
    qkv = h @ p["attn_w"].T + p["attn_b"]
    q, k, v = jnp.split(qkv, 3, axis=-1)
    q = q.reshape(B, T, n_head, hd).transpose(0, 2, 1, 3)
    k = k.reshape(B, T, n_head, hd).transpose(0, 2, 1, 3)
    v = v.reshape(B, T, n_head, hd).transpose(0, 2, 1, 3)
    s = (q @ jnp.swapaxes(k, -1, -2)) / math.sqrt(hd)
    mask = jnp.tril(jnp.ones((T, T), dtype=bool))
    s = jnp.where(mask, s, -jnp.inf)
    att = jax.nn.softmax(s, axis=-1)
    y = (att @ v).transpose(0, 2, 1, 3).reshape(B, T, C)
    x = x + (y @ p["proj_w"].T + p["proj_b"])
    h2 = ln(x, p["ln2_w"], p["ln2_b"])
    m = _gelu_new(h2 @ p["fc_w"].T + p["fc_b"])
    m = _gelu_new(m @ p["out_w"].T + p["out_b"])
    x = x + m
    return x, (k, v)


# -----------------------------------------------------------------------------
# Demo / correctness check
# -----------------------------------------------------------------------------
if __name__ == "__main__":
    key = jax.random.PRNGKey(0)
    B, T = 2, 8                  # batch, sequence (block_size=8)
    C, H, HID = 32, 4, 64        # n_embd, n_head, hidden_size
    eps = 1e-5

    ks = jax.random.split(key, 13)

    def nrm(k, shape, scale=0.02):
        return scale * jax.random.normal(k, shape, dtype=jnp.float32)

    params = {
        "ln1_w": jnp.ones((C,), jnp.float32) + nrm(ks[0], (C,), 0.05),
        "ln1_b": nrm(ks[1], (C,), 0.05),
        "attn_w": nrm(ks[2], (3 * C, C)),      # torch Linear layout: (out, in)
        "attn_b": nrm(ks[3], (3 * C,)),
        "proj_w": nrm(ks[4], (C, C)),
        "proj_b": nrm(ks[5], (C,)),
        "ln2_w": jnp.ones((C,), jnp.float32) + nrm(ks[6], (C,), 0.05),
        "ln2_b": nrm(ks[7], (C,), 0.05),
        "fc_w": nrm(ks[8], (HID, C)),
        "fc_b": nrm(ks[9], (HID,)),
        "out_w": nrm(ks[10], (C, HID)),
        "out_b": nrm(ks[11], (C,)),
    }
    x = jax.random.normal(ks[12], (B, T, C), dtype=jnp.float32)

    fwd = jax.jit(functools.partial(block_forward, n_head=H, eps=eps))
    y, (k_p, v_p) = fwd(x, params)
    y = jax.block_until_ready(y)

    y_ref, (k_ref, v_ref) = reference_block_forward(x, params, H, eps)

    assert jnp.allclose(y, y_ref, atol=2e-3, rtol=2e-3), "block output mismatch vs reference"
    assert jnp.allclose(k_p, k_ref, atol=1e-3, rtol=1e-3), "present[k] mismatch vs reference"
    assert jnp.allclose(v_p, v_ref, atol=1e-3, rtol=1e-3), "present[v] mismatch vs reference"

    print("KERNEL_OK")
</pallas_src>

<mosaic_0001>
module attributes {stable_mosaic.version = 11 : i64} {
  func.func @_linear_kernel(%arg0: i32, %arg1: i32, %arg2: i32, %arg3: memref<16x32xf32, #tpu.memory_space<vmem>>, %arg4: memref<32x96xf32, #tpu.memory_space<vmem>>, %arg5: memref<1x96xf32, #tpu.memory_space<vmem>>, %arg6: memref<16x96xf32, #tpu.memory_space<vmem>>, %arg7: memref<16x96xf32, #tpu.memory_space<vmem>>) attributes {dimension_semantics = [#tpu.dimension_semantics<parallel>, #tpu.dimension_semantics<parallel>, #tpu.dimension_semantics<arbitrary>], iteration_bounds = array<i64: 1, 1, 1>, scalar_prefetch = 0 : i64, scratch_operands = 1 : i64, tpu.core_type = #tpu.core_type<tc>, window_params = [{transform_indices = @transform_0, window_bounds = array<i64: 16, 32>}, {transform_indices = @transform_1, window_bounds = array<i64: 32, 96>}, {transform_indices = @transform_2, window_bounds = array<i64: 1, 96>}, {transform_indices = @transform_3, window_bounds = array<i64: 16, 96>}]} {
    %c0_i32 = arith.constant 0 : i32
    %0 = arith.cmpi eq, %arg2, %c0_i32 : i32
    %1 = arith.extui %0 : i1 to i32
    %c0_i32_0 = arith.constant 0 : i32
    %2 = arith.cmpi ne, %1, %c0_i32_0 : i32
    scf.if %2 {
      %cst_10 = arith.constant 0.000000e+00 : f32
      %12 = vector.broadcast %cst_10 : f32 to vector<16x96xf32>
      %c0_11 = arith.constant 0 : index
      %c0_12 = arith.constant 0 : index
      %13 = vector.load %arg7[%c0_11, %c0_12] : memref<16x96xf32, #tpu.memory_space<vmem>>, vector<16x96xf32>
      tpu.vector_store %arg7[%c0_11, %c0_12], %12 {strides = array<i32>} : memref<16x96xf32, #tpu.memory_space<vmem>>, vector<16x96xf32>,
    } else {
    }
    %c0 = arith.constant 0 : index
    %c0_1 = arith.constant 0 : index
    %3 = vector.load %arg7[%c0, %c0_1] : memref<16x96xf32, #tpu.memory_space<vmem>>, vector<16x96xf32>
    %c0_2 = arith.constant 0 : index
    %c0_3 = arith.constant 0 : index
    %4 = vector.load %arg3[%c0_2, %c0_3] : memref<16x32xf32, #tpu.memory_space<vmem>>, vector<16x32xf32>
    %c0_4 = arith.constant 0 : index
    %c0_5 = arith.constant 0 : index
    %5 = vector.load %arg4[%c0_4, %c0_5] : memref<32x96xf32, #tpu.memory_space<vmem>>, vector<32x96xf32>
    %cst = arith.constant dense<0.000000e+00> : vector<16x96xf32>
    %6 = tpu.matmul %4, %5, %cst {dimension_numbers = #tpu.dot_dimension_numbers<[1], [0], [0], [1], [0, 0, 1, 1], [], []>} : vector<16x32xf32>, vector<32x96xf32>, vector<16x96xf32> -> vector<16x96xf32>
    %7 = arith.addf %3, %6 : vector<16x96xf32>
    %c0_6 = arith.constant 0 : index
    %c0_7 = arith.constant 0 : index
    %8 = vector.load %arg7[%c0_6, %c0_7] : memref<16x96xf32, #tpu.memory_space<vmem>>, vector<16x96xf32>
    tpu.vector_store %arg7[%c0_6, %c0_7], %7 {strides = array<i32>} : memref<16x96xf32, #tpu.memory_space<vmem>>, vector<16x96xf32>,
    %c0_i32_8 = arith.constant 0 : i32
    %9 = arith.cmpi eq, %arg2, %c0_i32_8 : i32
    %10 = arith.extui %9 : i1 to i32
    %c0_i32_9 = arith.constant 0 : i32
    %11 = arith.cmpi ne, %10, %c0_i32_9 : i32
    scf.if %11 {
      %c0_10 = arith.constant 0 : index
      %c0_11 = arith.constant 0 : index
      %12 = vector.load %arg7[%c0_10, %c0_11] : memref<16x96xf32, #tpu.memory_space<vmem>>, vector<16x96xf32>
      %c0_12 = arith.constant 0 : index
      %c0_13 = arith.constant 0 : index
      %13 = vector.load %arg5[%c0_12, %c0_13] : memref<1x96xf32, #tpu.memory_space<vmem>>, vector<1x96xf32>
      %14 = vector.broadcast %13 : vector<1x96xf32> to vector<16x96xf32>
      %15 = arith.addf %12, %14 : vector<16x96xf32>
      %c0_14 = arith.constant 0 : index
      %c0_15 = arith.constant 0 : index
      %16 = vector.load %arg6[%c0_14, %c0_15] : memref<16x96xf32, #tpu.memory_space<vmem>>, vector<16x96xf32>
      tpu.vector_store %arg6[%c0_14, %c0_15], %15 {strides = array<i32>} : memref<16x96xf32, #tpu.memory_space<vmem>>, vector<16x96xf32>,
    } else {
    }
    return
  }
  func.func @transform_0(%arg0: i32, %arg1: i32, %arg2: i32) -> (i32, i32) {
    %c0_i32 = arith.constant 0 : i32
    return %arg0, %arg2 : i32, i32
  }
  func.func @transform_1(%arg0: i32, %arg1: i32, %arg2: i32) -> (i32, i32) {
    %c0_i32 = arith.constant 0 : i32
    return %arg2, %arg1 : i32, i32
  }
  func.func @transform_2(%arg0: i32, %arg1: i32, %arg2: i32) -> (i32, i32) {
    %c0_i32 = arith.constant 0 : i32
    %c0_i32_0 = arith.constant 0 : i32
    return %c0_i32, %arg1 : i32, i32
  }
  func.func @transform_3(%arg0: i32, %arg1: i32, %arg2: i32) -> (i32, i32) {
    %c0_i32 = arith.constant 0 : i32
    return %arg0, %arg1 : i32, i32
  }
}

module attributes {stable_mosaic.version = 11 : i64} {
  func.func @_layer_norm_kernel(%arg0: i32, %arg1: memref<16x32xf32, #tpu.memory_space<vmem>>, %arg2: memref<1x32xf32, #tpu.memory_space<vmem>>, %arg3: memref<1x32xf32, #tpu.memory_space<vmem>>, %arg4: memref<16x32xf32, #tpu.memory_space<vmem>>) attributes {dimension_semantics = [#tpu.dimension_semantics<parallel>], iteration_bounds = array<i64: 1>, scalar_prefetch = 0 : i64, scratch_operands = 0 : i64, tpu.core_type = #tpu.core_type<tc>, window_params = [{transform_indices = @transform_0, window_bounds = array<i64: 16, 32>}, {pipeline_mode = #tpu.pipeline_mode<synchronous>, transform_indices = @transform_1, window_bounds = array<i64: 1, 32>}, {pipeline_mode = #tpu.pipeline_mode<synchronous>, transform_indices = @transform_2, window_bounds = array<i64: 1, 32>}, {transform_indices = @transform_3, window_bounds = array<i64: 16, 32>}]} {
    %c0 = arith.constant 0 : index
    %c0_0 = arith.constant 0 : index
    %0 = vector.load %arg1[%c0, %c0_0] : memref<16x32xf32, #tpu.memory_space<vmem>>, vector<16x32xf32>
    %cst = arith.constant dense<0.000000e+00> : vector<16xf32>
    %1 = vector.multi_reduction <add>, %0, %cst [1] : vector<16x32xf32> to vector<16xf32>
    %2 = vector.shape_cast %1 : vector<16xf32> to vector<16x1xf32>
    %cst_1 = arith.constant 3.200000e+01 : f32
    %3 = vector.broadcast %cst_1 : f32 to vector<16x1xf32>
    %4 = arith.divf %2, %3 : vector<16x1xf32>
    %5 = vector.broadcast %4 : vector<16x1xf32> to vector<16x32xf32>
    %6 = arith.subf %0, %5 : vector<16x32xf32>
    %7 = arith.mulf %6, %6 : vector<16x32xf32>
    %cst_2 = arith.constant dense<0.000000e+00> : vector<16xf32>
    %8 = vector.multi_reduction <add>, %7, %cst_2 [1] : vector<16x32xf32> to vector<16xf32>
    %9 = vector.shape_cast %8 : vector<16xf32> to vector<16x1xf32>
    %cst_3 = arith.constant 3.200000e+01 : f32
    %10 = vector.broadcast %cst_3 : f32 to vector<16x1xf32>
    %11 = arith.divf %9, %10 : vector<16x1xf32>
    %cst_4 = arith.constant 9.99999974E-6 : f32
    %12 = vector.broadcast %cst_4 : f32 to vector<16x1xf32>
    %13 = arith.addf %11, %12 : vector<16x1xf32>
    %14 = math.rsqrt %13 : vector<16x1xf32>
    %15 = vector.broadcast %14 : vector<16x1xf32> to vector<16x32xf32>
    %16 = arith.mulf %6, %15 : vector<16x32xf32>
    %c0_5 = arith.constant 0 : index
    %c0_6 = arith.constant 0 : index
    %17 = vector.load %arg2[%c0_5, %c0_6] : memref<1x32xf32, #tpu.memory_space<vmem>>, vector<1x32xf32>
    %18 = vector.broadcast %17 : vector<1x32xf32> to vector<16x32xf32>
    %19 = arith.mulf %16, %18 : vector<16x32xf32>
    %c0_7 = arith.constant 0 : index
    %c0_8 = arith.constant 0 : index
    %20 = vector.load %arg3[%c0_7, %c0_8] : memref<1x32xf32, #tpu.memory_space<vmem>>, vector<1x32xf32>
    %21 = vector.broadcast %20 : vector<1x32xf32> to vector<16x32xf32>
    %22 = arith.addf %19, %21 : vector<16x32xf32>
    %c0_9 = arith.constant 0 : index
    %c0_10 = arith.constant 0 : index
    %23 = vector.load %arg4[%c0_9, %c0_10] : memref<16x32xf32, #tpu.memory_space<vmem>>, vector<16x32xf32>
    tpu.vector_store %arg4[%c0_9, %c0_10], %22 {strides = array<i32>} : memref<16x32xf32, #tpu.memory_space<vmem>>, vector<16x32xf32>,
    return
  }
  func.func @transform_0(%arg0: i32) -> (i32, i32) {
    %c0_i32 = arith.constant 0 : i32
    %c0_i32_0 = arith.constant 0 : i32
    return %arg0, %c0_i32 : i32, i32
  }
  func.func @transform_1(%arg0: i32) -> (i32, i32) {
    %c0_i32 = arith.constant 0 : i32
    %c0_i32_0 = arith.constant 0 : i32
    %c0_i32_1 = arith.constant 0 : i32
    return %c0_i32, %c0_i32_0 : i32, i32
  }
  func.func @transform_2(%arg0: i32) -> (i32, i32) {
    %c0_i32 = arith.constant 0 : i32
    %c0_i32_0 = arith.constant 0 : i32
    %c0_i32_1 = arith.constant 0 : i32
    return %c0_i32, %c0_i32_0 : i32, i32
  }
  func.func @transform_3(%arg0: i32) -> (i32, i32) {
    %c0_i32 = arith.constant 0 : i32
    %c0_i32_0 = arith.constant 0 : i32
    return %arg0, %c0_i32 : i32, i32
  }
}

module attributes {stable_mosaic.version = 11 : i64} {
  func.func @_causal_attn_kernel(%arg0: i32, %arg1: i32, %arg2: memref<1x1x8x8xf32, #tpu.memory_space<vmem>>, %arg3: memref<1x1x8x8xf32, #tpu.memory_space<vmem>>, %arg4: memref<1x1x8x8xf32, #tpu.memory_space<vmem>>, %arg5: memref<1x1x8x8xf32, #tpu.memory_space<vmem>>) attributes {dimension_semantics = [#tpu.dimension_semantics<parallel>, #tpu.dimension_semantics<parallel>], iteration_bounds = array<i64: 2, 4>, scalar_prefetch = 0 : i64, scratch_operands = 0 : i64, tpu.core_type = #tpu.core_type<tc>, window_params = [{transform_indices = @transform_0, window_bounds = array<i64: 1, 1, 8, 8>}, {transform_indices = @transform_1, window_bounds = array<i64: 1, 1, 8, 8>}, {transform_indices = @transform_2, window_bounds = array<i64: 1, 1, 8, 8>}, {transform_indices = @transform_3, window_bounds = array<i64: 1, 1, 8, 8>}]} {
    %c0 = arith.constant 0 : index
    %c0_0 = arith.constant 0 : index
    %c0_1 = arith.constant 0 : index
    %c0_2 = arith.constant 0 : index
    %0 = vector.load %arg2[%c0, %c0_0, %c0_1, %c0_2] : memref<1x1x8x8xf32, #tpu.memory_space<vmem>>, vector<1x1x8x8xf32>
    %1 = vector.shape_cast %0 : vector<1x1x8x8xf32> to vector<8x8xf32>
    %c0_3 = arith.constant 0 : index
    %c0_4 = arith.constant 0 : index
    %c0_5 = arith.constant 0 : index
    %c0_6 = arith.constant 0 : index
    %2 = vector.load %arg3[%c0_3, %c0_4, %c0_5, %c0_6] : memref<1x1x8x8xf32, #tpu.memory_space<vmem>>, vector<1x1x8x8xf32>
    %3 = vector.shape_cast %2 : vector<1x1x8x8xf32> to vector<8x8xf32>
    %c0_7 = arith.constant 0 : index
    %c0_8 = arith.constant 0 : index
    %c0_9 = arith.constant 0 : index
    %c0_10 = arith.constant 0 : index
    %4 = vector.load %arg4[%c0_7, %c0_8, %c0_9, %c0_10] : memref<1x1x8x8xf32, #tpu.memory_space<vmem>>, vector<1x1x8x8xf32>
    %5 = vector.shape_cast %4 : vector<1x1x8x8xf32> to vector<8x8xf32>
    %cst = arith.constant dense<0.000000e+00> : vector<8x8xf32>
    %6 = tpu.matmul %1, %3, %cst {dimension_numbers = #tpu.dot_dimension_numbers<[1], [1], [0], [0], [0, 0, 1, 0], [], []>} : vector<8x8xf32>, vector<8x8xf32>, vector<8x8xf32> -> vector<8x8xf32>
    %cst_11 = arith.constant 0.353553385 : f32
    %7 = vector.broadcast %cst_11 : f32 to vector<8x8xf32>
    %8 = arith.mulf %6, %7 : vector<8x8xf32>
    %9 = tpu.iota {dimensions = array<i32: 0>} : vector<8x8xi32>
    %10 = tpu.iota {dimensions = array<i32: 1>} : vector<8x8xi32>
    %11 = arith.cmpi sle, %10, %9 : vector<8x8xi32>
    %cst_12 = arith.constant -1.000000e+30 : f32
    %12 = vector.broadcast %cst_12 : f32 to vector<8x8xf32>
    %13 = arith.select %11, %8, %12 : vector<8x8xi1>, vector<8x8xf32>
    %cst_13 = arith.constant dense<0xFF800000> : vector<8xf32>
    %14 = vector.multi_reduction <maximumf>, %13, %cst_13 [1] : vector<8x8xf32> to vector<8xf32>
    %15 = vector.shape_cast %14 : vector<8xf32> to vector<8x1xf32>
    %16 = vector.broadcast %15 : vector<8x1xf32> to vector<8x8xf32>
    %17 = arith.subf %13, %16 : vector<8x8xf32>
    %18 = math.exp %17 : vector<8x8xf32>
    %cst_14 = arith.constant dense<0.000000e+00> : vector<8xf32>
    %19 = vector.multi_reduction <add>, %18, %cst_14 [1] : vector<8x8xf32> to vector<8xf32>
    %20 = vector.shape_cast %19 : vector<8xf32> to vector<8x1xf32>
    %21 = vector.broadcast %20 : vector<8x1xf32> to vector<8x8xf32>
    %22 = arith.divf %18, %21 : vector<8x8xf32>
    %cst_15 = arith.constant dense<0.000000e+00> : vector<8x8xf32>
    %23 = tpu.matmul %22, %5, %cst_15 {dimension_numbers = #tpu.dot_dimension_numbers<[1], [0], [0], [1], [0, 0, 1, 1], [], []>} : vector<8x8xf32>, vector<8x8xf32>, vector<8x8xf32> -> vector<8x8xf32>
    %c0_16 = arith.constant 0 : index
    %c0_17 = arith.constant 0 : index
    %c0_18 = arith.constant 0 : index
    %c0_19 = arith.constant 0 : index
    %24 = vector.load %arg5[%c0_16, %c0_17, %c0_18, %c0_19] : memref<1x1x8x8xf32, #tpu.memory_space<vmem>>, vector<1x1x8x8xf32>
    %25 = vector.shape_cast %24 : vector<1x1x8x8xf32> to vector<8x8xf32>
    %26 = vector.shape_cast %23 : vector<8x8xf32> to vector<1x1x8x8xf32>
    tpu.vector_store %arg5[%c0_16, %c0_17, %c0_18, %c0_19], %26 {strides = array<i32>} : memref<1x1x8x8xf32, #tpu.memory_space<vmem>>, vector<1x1x8x8xf32>,
    return
  }
  func.func @transform_0(%arg0: i32, %arg1: i32) -> (i32, i32, i32, i32) {
    %c0_i32 = arith.constant 0 : i32
    %c0_i32_0 = arith.constant 0 : i32
    %c0_i32_1 = arith.constant 0 : i32
    return %arg0, %arg1, %c0_i32, %c0_i32_0 : i32, i32, i32, i32
  }
  func.func @transform_1(%arg0: i32, %arg1: i32) -> (i32, i32, i32, i32) {
    %c0_i32 = arith.constant 0 : i32
    %c0_i32_0 = arith.constant 0 : i32
    %c0_i32_1 = arith.constant 0 : i32
    return %arg0, %arg1, %c0_i32, %c0_i32_0 : i32, i32, i32, i32
  }
  func.func @transform_2(%arg0: i32, %arg1: i32) -> (i32, i32, i32, i32) {
    %c0_i32 = arith.constant 0 : i32
    %c0_i32_0 = arith.constant 0 : i32
    %c0_i32_1 = arith.constant 0 : i32
    return %arg0, %arg1, %c0_i32, %c0_i32_0 : i32, i32, i32, i32
  }
  func.func @transform_3(%arg0: i32, %arg1: i32) -> (i32, i32, i32, i32) {
    %c0_i32 = arith.constant 0 : i32
    %c0_i32_0 = arith.constant 0 : i32
    %c0_i32_1 = arith.constant 0 : i32
    return %arg0, %arg1, %c0_i32, %c0_i32_0 : i32, i32, i32, i32
  }
}

module attributes {stable_mosaic.version = 11 : i64} {
  func.func @_linear_kernel(%arg0: i32, %arg1: i32, %arg2: i32, %arg3: memref<16x32xf32, #tpu.memory_space<vmem>>, %arg4: memref<32x32xf32, #tpu.memory_space<vmem>>, %arg5: memref<1x32xf32, #tpu.memory_space<vmem>>, %arg6: memref<16x32xf32, #tpu.memory_space<vmem>>, %arg7: memref<16x32xf32, #tpu.memory_space<vmem>>) attributes {dimension_semantics = [#tpu.dimension_semantics<parallel>, #tpu.dimension_semantics<parallel>, #tpu.dimension_semantics<arbitrary>], iteration_bounds = array<i64: 1, 1, 1>, scalar_prefetch = 0 : i64, scratch_operands = 1 : i64, tpu.core_type = #tpu.core_type<tc>, window_params = [{transform_indices = @transform_0, window_bounds = array<i64: 16, 32>}, {transform_indices = @transform_1, window_bounds = array<i64: 32, 32>}, {transform_indices = @transform_2, window_bounds = array<i64: 1, 32>}, {transform_indices = @transform_3, window_bounds = array<i64: 16, 32>}]} {
    %c0_i32 = arith.constant 0 : i32
    %0 = arith.cmpi eq, %arg2, %c0_i32 : i32
    %1 = arith.extui %0 : i1 to i32
    %c0_i32_0 = arith.constant 0 : i32
    %2 = arith.cmpi ne, %1, %c0_i32_0 : i32
    scf.if %2 {
      %cst_10 = arith.constant 0.000000e+00 : f32
      %12 = vector.broadcast %cst_10 : f32 to vector<16x32xf32>
      %c0_11 = arith.constant 0 : index
      %c0_12 = arith.constant 0 : index
      %13 = vector.load %arg7[%c0_11, %c0_12] : memref<16x32xf32, #tpu.memory_space<vmem>>, vector<16x32xf32>
      tpu.vector_store %arg7[%c0_11, %c0_12], %12 {strides = array<i32>} : memref<16x32xf32, #tpu.memory_space<vmem>>, vector<16x32xf32>,
    } else {
    }
    %c0 = arith.constant 0 : index
    %c0_1 = arith.constant 0 : index
    %3 = vector.load %arg7[%c0, %c0_1] : memref<16x32xf32, #tpu.memory_space<vmem>>, vector<16x32xf32>
    %c0_2 = arith.constant 0 : index
    %c0_3 = arith.constant 0 : index
    %4 = vector.load %arg3[%c0_2, %c0_3] : memref<16x32xf32, #tpu.memory_space<vmem>>, vector<16x32xf32>
    %c0_4 = arith.constant 0 : index
    %c0_5 = arith.constant 0 : index
    %5 = vector.load %arg4[%c0_4, %c0_5] : memref<32x32xf32, #tpu.memory_space<vmem>>, vector<32x32xf32>
    %cst = arith.constant dense<0.000000e+00> : vector<16x32xf32>
    %6 = tpu.matmul %4, %5, %cst {dimension_numbers = #tpu.dot_dimension_numbers<[1], [0], [0], [1], [0, 0, 1, 1], [], []>} : vector<16x32xf32>, vector<32x32xf32>, vector<16x32xf32> -> vector<16x32xf32>
    %7 = arith.addf %3, %6 : vector<16x32xf32>
    %c0_6 = arith.constant 0 : index
    %c0_7 = arith.constant 0 : index
    %8 = vector.load %arg7[%c0_6, %c0_7] : memref<16x32xf32, #tpu.memory_space<vmem>>, vector<16x32xf32>
    tpu.vector_store %arg7[%c0_6, %c0_7], %7 {strides = array<i32>} : memref<16x32xf32, #tpu.memory_space<vmem>>, vector<16x32xf32>,
    %c0_i32_8 = arith.constant 0 : i32
    %9 = arith.cmpi eq, %arg2, %c0_i32_8 : i32
    %10 = arith.extui %9 : i1 to i32
    %c0_i32_9 = arith.constant 0 : i32
    %11 = arith.cmpi ne, %10, %c0_i32_9 : i32
    scf.if %11 {
      %c0_10 = arith.constant 0 : index
      %c0_11 = arith.constant 0 : index
      %12 = vector.load %arg7[%c0_10, %c0_11] : memref<16x32xf32, #tpu.memory_space<vmem>>, vector<16x32xf32>
      %c0_12 = arith.constant 0 : index
      %c0_13 = arith.constant 0 : index
      %13 = vector.load %arg5[%c0_12, %c0_13] : memref<1x32xf32, #tpu.memory_space<vmem>>, vector<1x32xf32>
      %14 = vector.broadcast %13 : vector<1x32xf32> to vector<16x32xf32>
      %15 = arith.addf %12, %14 : vector<16x32xf32>
      %c0_14 = arith.constant 0 : index
      %c0_15 = arith.constant 0 : index
      %16 = vector.load %arg6[%c0_14, %c0_15] : memref<16x32xf32, #tpu.memory_space<vmem>>, vector<16x32xf32>
      tpu.vector_store %arg6[%c0_14, %c0_15], %15 {strides = array<i32>} : memref<16x32xf32, #tpu.memory_space<vmem>>, vector<16x32xf32>,
    } else {
    }
    return
  }
  func.func @transform_0(%arg0: i32, %arg1: i32, %arg2: i32) -> (i32, i32) {
    %c0_i32 = arith.constant 0 : i32
    return %arg0, %arg2 : i32, i32
  }
  func.func @transform_1(%arg0: i32, %arg1: i32, %arg2: i32) -> (i32, i32) {
    %c0_i32 = arith.constant 0 : i32
    return %arg2, %arg1 : i32, i32
  }
  func.func @transform_2(%arg0: i32, %arg1: i32, %arg2: i32) -> (i32, i32) {
    %c0_i32 = arith.constant 0 : i32
    %c0_i32_0 = arith.constant 0 : i32
    return %c0_i32, %arg1 : i32, i32
  }
  func.func @transform_3(%arg0: i32, %arg1: i32, %arg2: i32) -> (i32, i32) {
    %c0_i32 = arith.constant 0 : i32
    return %arg0, %arg1 : i32, i32
  }
}

module attributes {stable_mosaic.version = 11 : i64} {
  func.func @_linear_kernel(%arg0: i32, %arg1: i32, %arg2: i32, %arg3: memref<16x32xf32, #tpu.memory_space<vmem>>, %arg4: memref<32x64xf32, #tpu.memory_space<vmem>>, %arg5: memref<1x64xf32, #tpu.memory_space<vmem>>, %arg6: memref<16x64xf32, #tpu.memory_space<vmem>>, %arg7: memref<16x64xf32, #tpu.memory_space<vmem>>) attributes {dimension_semantics = [#tpu.dimension_semantics<parallel>, #tpu.dimension_semantics<parallel>, #tpu.dimension_semantics<arbitrary>], iteration_bounds = array<i64: 1, 1, 1>, scalar_prefetch = 0 : i64, scratch_operands = 1 : i64, tpu.core_type = #tpu.core_type<tc>, window_params = [{transform_indices = @transform_0, window_bounds = array<i64: 16, 32>}, {transform_indices = @transform_1, window_bounds = array<i64: 32, 64>}, {transform_indices = @transform_2, window_bounds = array<i64: 1, 64>}, {transform_indices = @transform_3, window_bounds = array<i64: 16, 64>}]} {
    %c0_i32 = arith.constant 0 : i32
    %0 = arith.cmpi eq, %arg2, %c0_i32 : i32
    %1 = arith.extui %0 : i1 to i32
    %c0_i32_0 = arith.constant 0 : i32
    %2 = arith.cmpi ne, %1, %c0_i32_0 : i32
    scf.if %2 {
      %cst_10 = arith.constant 0.000000e+00 : f32
      %12 = vector.broadcast %cst_10 : f32 to vector<16x64xf32>
      %c0_11 = arith.constant 0 : index
      %c0_12 = arith.constant 0 : index
      %13 = vector.load %arg7[%c0_11, %c0_12] : memref<16x64xf32, #tpu.memory_space<vmem>>, vector<16x64xf32>
      tpu.vector_store %arg7[%c0_11, %c0_12], %12 {strides = array<i32>} : memref<16x64xf32, #tpu.memory_space<vmem>>, vector<16x64xf32>,
    } else {
    }
    %c0 = arith.constant 0 : index
    %c0_1 = arith.constant 0 : index
    %3 = vector.load %arg7[%c0, %c0_1] : memref<16x64xf32, #tpu.memory_space<vmem>>, vector<16x64xf32>
    %c0_2 = arith.constant 0 : index
    %c0_3 = arith.constant 0 : index
    %4 = vector.load %arg3[%c0_2, %c0_3] : memref<16x32xf32, #tpu.memory_space<vmem>>, vector<16x32xf32>
    %c0_4 = arith.constant 0 : index
    %c0_5 = arith.constant 0 : index
    %5 = vector.load %arg4[%c0_4, %c0_5] : memref<32x64xf32, #tpu.memory_space<vmem>>, vector<32x64xf32>
    %cst = arith.constant dense<0.000000e+00> : vector<16x64xf32>
    %6 = tpu.matmul %4, %5, %cst {dimension_numbers = #tpu.dot_dimension_numbers<[1], [0], [0], [1], [0, 0, 1, 1], [], []>} : vector<16x32xf32>, vector<32x64xf32>, vector<16x64xf32> -> vector<16x64xf32>
    %7 = arith.addf %3, %6 : vector<16x64xf32>
    %c0_6 = arith.constant 0 : index
    %c0_7 = arith.constant 0 : index
    %8 = vector.load %arg7[%c0_6, %c0_7] : memref<16x64xf32, #tpu.memory_space<vmem>>, vector<16x64xf32>
    tpu.vector_store %arg7[%c0_6, %c0_7], %7 {strides = array<i32>} : memref<16x64xf32, #tpu.memory_space<vmem>>, vector<16x64xf32>,
    %c0_i32_8 = arith.constant 0 : i32
    %9 = arith.cmpi eq, %arg2, %c0_i32_8 : i32
    %10 = arith.extui %9 : i1 to i32
    %c0_i32_9 = arith.constant 0 : i32
    %11 = arith.cmpi ne, %10, %c0_i32_9 : i32
    scf.if %11 {
      %c0_10 = arith.constant 0 : index
      %c0_11 = arith.constant 0 : index
      %12 = vector.load %arg7[%c0_10, %c0_11] : memref<16x64xf32, #tpu.memory_space<vmem>>, vector<16x64xf32>
      %c0_12 = arith.constant 0 : index
      %c0_13 = arith.constant 0 : index
      %13 = vector.load %arg5[%c0_12, %c0_13] : memref<1x64xf32, #tpu.memory_space<vmem>>, vector<1x64xf32>
      %14 = vector.broadcast %13 : vector<1x64xf32> to vector<16x64xf32>
      %15 = arith.addf %12, %14 : vector<16x64xf32>
      %cst_14 = arith.constant 5.000000e-01 : f32
      %16 = vector.broadcast %cst_14 : f32 to vector<16x64xf32>
      %17 = arith.mulf %16, %15 : vector<16x64xf32>
      %18 = arith.mulf %15, %15 : vector<16x64xf32>
      %19 = arith.mulf %18, %15 : vector<16x64xf32>
      %cst_15 = arith.constant 4.471500e-02 : f32
      %20 = vector.broadcast %cst_15 : f32 to vector<16x64xf32>
      %21 = arith.mulf %20, %19 : vector<16x64xf32>
      %22 = arith.addf %15, %21 : vector<16x64xf32>
      %cst_16 = arith.constant 0.797884583 : f32
      %23 = vector.broadcast %cst_16 : f32 to vector<16x64xf32>
      %24 = arith.mulf %23, %22 : vector<16x64xf32>
      %25 = math.tanh %24 : vector<16x64xf32>
      %cst_17 = arith.constant 1.000000e+00 : f32
      %26 = vector.broadcast %cst_17 : f32 to vector<16x64xf32>
      %27 = arith.addf %26, %25 : vector<16x64xf32>
      %28 = arith.mulf %17, %27 : vector<16x64xf32>
      %c0_18 = arith.constant 0 : index
      %c0_19 = arith.constant 0 : index
      %29 = vector.load %arg6[%c0_18, %c0_19] : memref<16x64xf32, #tpu.memory_space<vmem>>, vector<16x64xf32>
      tpu.vector_store %arg6[%c0_18, %c0_19], %28 {strides = array<i32>} : memref<16x64xf32, #tpu.memory_space<vmem>>, vector<16x64xf32>,
    } else {
    }
    return
  }
  func.func @transform_0(%arg0: i32, %arg1: i32, %arg2: i32) -> (i32, i32) {
    %c0_i32 = arith.constant 0 : i32
    return %arg0, %arg2 : i32, i32
  }
  func.func @transform_1(%arg0: i32, %arg1: i32, %arg2: i32) -> (i32, i32) {
    %c0_i32 = arith.constant 0 : i32
    return %arg2, %arg1 : i32, i32
  }
  func.func @transform_2(%arg0: i32, %arg1: i32, %arg2: i32) -> (i32, i32) {
    %c0_i32 = arith.constant 0 : i32
    %c0_i32_0 = arith.constant 0 : i32
    return %c0_i32, %arg1 : i32, i32
  }
  func.func @transform_3(%arg0: i32, %arg1: i32, %arg2: i32) -> (i32, i32) {
    %c0_i32 = arith.constant 0 : i32
    return %arg0, %arg1 : i32, i32
  }
}

module attributes {stable_mosaic.version = 11 : i64} {
  func.func @_layer_norm_kernel(%arg0: i32, %arg1: memref<16x32xf32, #tpu.memory_space<vmem>>, %arg2: memref<1x32xf32, #tpu.memory_space<vmem>>, %arg3: memref<1x32xf32, #tpu.memory_space<vmem>>, %arg4: memref<16x32xf32, #tpu.memory_space<vmem>>) attributes {dimension_semantics = [#tpu.dimension_semantics<parallel>], iteration_bounds = array<i64: 1>, scalar_prefetch = 0 : i64, scratch_operands = 0 : i64, tpu.core_type = #tpu.core_type<tc>, window_params = [{transform_indices = @transform_0, window_bounds = array<i64: 16, 32>}, {pipeline_mode = #tpu.pipeline_mode<synchronous>, transform_indices = @transform_1, window_bounds = array<i64: 1, 32>}, {pipeline_mode = #tpu.pipeline_mode<synchronous>, transform_indices = @transform_2, window_bounds = array<i64: 1, 32>}, {transform_indices = @transform_3, window_bounds = array<i64: 16, 32>}]} {
    %c0 = arith.constant 0 : index
    %c0_0 = arith.constant 0 : index
    %0 = vector.load %arg1[%c0, %c0_0] : memref<16x32xf32, #tpu.memory_space<vmem>>, vector<16x32xf32>
    %cst = arith.constant dense<0.000000e+00> : vector<16xf32>
    %1 = vector.multi_reduction <add>, %0, %cst [1] : vector<16x32xf32> to vector<16xf32>
    %2 = vector.shape_cast %1 : vector<16xf32> to vector<16x1xf32>
    %cst_1 = arith.constant 3.200000e+01 : f32
    %3 = vector.broadcast %cst_1 : f32 to vector<16x1xf32>
    %4 = arith.divf %2, %3 : vector<16x1xf32>
    %5 = vector.broadcast %4 : vector<16x1xf32> to vector<16x32xf32>
    %6 = arith.subf %0, %5 : vector<16x32xf32>
    %7 = arith.mulf %6, %6 : vector<16x32xf32>
    %cst_2 = arith.constant dense<0.000000e+00> : vector<16xf32>
    %8 = vector.multi_reduction <add>, %7, %cst_2 [1] : vector<16x32xf32> to vector<16xf32>
    %9 = vector.shape_cast %8 : vector<16xf32> to vector<16x1xf32>
    %cst_3 = arith.constant 3.200000e+01 : f32
    %10 = vector.broadcast %cst_3 : f32 to vector<16x1xf32>
    %11 = arith.divf %9, %10 : vector<16x1xf32>
    %cst_4 = arith.constant 9.99999974E-6 : f32
    %12 = vector.broadcast %cst_4 : f32 to vector<16x1xf32>
    %13 = arith.addf %11, %12 : vector<16x1xf32>
    %14 = math.rsqrt %13 : vector<16x1xf32>
    %15 = vector.broadcast %14 : vector<16x1xf32> to vector<16x32xf32>
    %16 = arith.mulf %6, %15 : vector<16x32xf32>
    %c0_5 = arith.constant 0 : index
    %c0_6 = arith.constant 0 : index
    %17 = vector.load %arg2[%c0_5, %c0_6] : memref<1x32xf32, #tpu.memory_space<vmem>>, vector<1x32xf32>
    %18 = vector.broadcast %17 : vector<1x32xf32> to vector<16x32xf32>
    %19 = arith.mulf %16, %18 : vector<16x32xf32>
    %c0_7 = arith.constant 0 : index
    %c0_8 = arith.constant 0 : index
    %20 = vector.load %arg3[%c0_7, %c0_8] : memref<1x32xf32, #tpu.memory_space<vmem>>, vector<1x32xf32>
    %21 = vector.broadcast %20 : vector<1x32xf32> to vector<16x32xf32>
    %22 = arith.addf %19, %21 : vector<16x32xf32>
    %c0_9 = arith.constant 0 : index
    %c0_10 = arith.constant 0 : index
    %23 = vector.load %arg4[%c0_9, %c0_10] : memref<16x32xf32, #tpu.memory_space<vmem>>, vector<16x32xf32>
    tpu.vector_store %arg4[%c0_9, %c0_10], %22 {strides = array<i32>} : memref<16x32xf32, #tpu.memory_space<vmem>>, vector<16x32xf32>,
    return
  }
  func.func @transform_0(%arg0: i32) -> (i32, i32) {
    %c0_i32 = arith.constant 0 : i32
    %c0_i32_0 = arith.constant 0 : i32
    return %arg0, %c0_i32 : i32, i32
  }
  func.func @transform_1(%arg0: i32) -> (i32, i32) {
    %c0_i32 = arith.constant 0 : i32
    %c0_i32_0 = arith.constant 0 : i32
    %c0_i32_1 = arith.constant 0 : i32
    return %c0_i32, %c0_i32_0 : i32, i32
  }
  func.func @transform_2(%arg0: i32) -> (i32, i32) {
    %c0_i32 = arith.constant 0 : i32
    %c0_i32_0 = arith.constant 0 : i32
    %c0_i32_1 = arith.constant 0 : i32
    return %c0_i32, %c0_i32_0 : i32, i32
  }
  func.func @transform_3(%arg0: i32) -> (i32, i32) {
    %c0_i32 = arith.constant 0 : i32
    %c0_i32_0 = arith.constant 0 : i32
    return %arg0, %c0_i32 : i32, i32
  }
}

module attributes {stable_mosaic.version = 11 : i64} {
  func.func @_linear_kernel(%arg0: i32, %arg1: i32, %arg2: i32, %arg3: memref<16x64xf32, #tpu.memory_space<vmem>>, %arg4: memref<64x32xf32, #tpu.memory_space<vmem>>, %arg5: memref<1x32xf32, #tpu.memory_space<vmem>>, %arg6: memref<16x32xf32, #tpu.memory_space<vmem>>, %arg7: memref<16x32xf32, #tpu.memory_space<vmem>>) attributes {dimension_semantics = [#tpu.dimension_semantics<parallel>, #tpu.dimension_semantics<parallel>, #tpu.dimension_semantics<arbitrary>], iteration_bounds = array<i64: 1, 1, 1>, scalar_prefetch = 0 : i64, scratch_operands = 1 : i64, tpu.core_type = #tpu.core_type<tc>, window_params = [{transform_indices = @transform_0, window_bounds = array<i64: 16, 64>}, {transform_indices = @transform_1, window_bounds = array<i64: 64, 32>}, {transform_indices = @transform_2, window_bounds = array<i64: 1, 32>}, {transform_indices = @transform_3, window_bounds = array<i64: 16, 32>}]} {
    %c0_i32 = arith.constant 0 : i32
    %0 = arith.cmpi eq, %arg2, %c0_i32 : i32
    %1 = arith.extui %0 : i1 to i32
    %c0_i32_0 = arith.constant 0 : i32
    %2 = arith.cmpi ne, %1, %c0_i32_0 : i32
    scf.if %2 {
      %cst_10 = arith.constant 0.000000e+00 : f32
      %12 = vector.broadcast %cst_10 : f32 to vector<16x32xf32>
      %c0_11 = arith.constant 0 : index
      %c0_12 = arith.constant 0 : index
      %13 = vector.load %arg7[%c0_11, %c0_12] : memref<16x32xf32, #tpu.memory_space<vmem>>, vector<16x32xf32>
      tpu.vector_store %arg7[%c0_11, %c0_12], %12 {strides = array<i32>} : memref<16x32xf32, #tpu.memory_space<vmem>>, vector<16x32xf32>,
    } else {
    }
    %c0 = arith.constant 0 : index
    %c0_1 = arith.constant 0 : index
    %3 = vector.load %arg7[%c0, %c0_1] : memref<16x32xf32, #tpu.memory_space<vmem>>, vector<16x32xf32>
    %c0_2 = arith.constant 0 : index
    %c0_3 = arith.constant 0 : index
    %4 = vector.load %arg3[%c0_2, %c0_3] : memref<16x64xf32, #tpu.memory_space<vmem>>, vector<16x64xf32>
    %c0_4 = arith.constant 0 : index
    %c0_5 = arith.constant 0 : index
    %5 = vector.load %arg4[%c0_4, %c0_5] : memref<64x32xf32, #tpu.memory_space<vmem>>, vector<64x32xf32>
    %cst = arith.constant dense<0.000000e+00> : vector<16x32xf32>
    %6 = tpu.matmul %4, %5, %cst {dimension_numbers = #tpu.dot_dimension_numbers<[1], [0], [0], [1], [0, 0, 1, 1], [], []>} : vector<16x64xf32>, vector<64x32xf32>, vector<16x32xf32> -> vector<16x32xf32>
    %7 = arith.addf %3, %6 : vector<16x32xf32>
    %c0_6 = arith.constant 0 : index
    %c0_7 = arith.constant 0 : index
    %8 = vector.load %arg7[%c0_6, %c0_7] : memref<16x32xf32, #tpu.memory_space<vmem>>, vector<16x32xf32>
    tpu.vector_store %arg7[%c0_6, %c0_7], %7 {strides = array<i32>} : memref<16x32xf32, #tpu.memory_space<vmem>>, vector<16x32xf32>,
    %c0_i32_8 = arith.constant 0 : i32
    %9 = arith.cmpi eq, %arg2, %c0_i32_8 : i32
    %10 = arith.extui %9 : i1 to i32
    %c0_i32_9 = arith.constant 0 : i32
    %11 = arith.cmpi ne, %10, %c0_i32_9 : i32
    scf.if %11 {
      %c0_10 = arith.constant 0 : index
      %c0_11 = arith.constant 0 : index
      %12 = vector.load %arg7[%c0_10, %c0_11] : memref<16x32xf32, #tpu.memory_space<vmem>>, vector<16x32xf32>
      %c0_12 = arith.constant 0 : index
      %c0_13 = arith.constant 0 : index
      %13 = vector.load %arg5[%c0_12, %c0_13] : memref<1x32xf32, #tpu.memory_space<vmem>>, vector<1x32xf32>
      %14 = vector.broadcast %13 : vector<1x32xf32> to vector<16x32xf32>
      %15 = arith.addf %12, %14 : vector<16x32xf32>
      %cst_14 = arith.constant 5.000000e-01 : f32
      %16 = vector.broadcast %cst_14 : f32 to vector<16x32xf32>
      %17 = arith.mulf %16, %15 : vector<16x32xf32>
      %18 = arith.mulf %15, %15 : vector<16x32xf32>
      %19 = arith.mulf %18, %15 : vector<16x32xf32>
      %cst_15 = arith.constant 4.471500e-02 : f32
      %20 = vector.broadcast %cst_15 : f32 to vector<16x32xf32>
      %21 = arith.mulf %20, %19 : vector<16x32xf32>
      %22 = arith.addf %15, %21 : vector<16x32xf32>
      %cst_16 = arith.constant 0.797884583 : f32
      %23 = vector.broadcast %cst_16 : f32 to vector<16x32xf32>
      %24 = arith.mulf %23, %22 : vector<16x32xf32>
      %25 = math.tanh %24 : vector<16x32xf32>
      %cst_17 = arith.constant 1.000000e+00 : f32
      %26 = vector.broadcast %cst_17 : f32 to vector<16x32xf32>
      %27 = arith.addf %26, %25 : vector<16x32xf32>
      %28 = arith.mulf %17, %27 : vector<16x32xf32>
      %c0_18 = arith.constant 0 : index
      %c0_19 = arith.constant 0 : index
      %29 = vector.load %arg6[%c0_18, %c0_19] : memref<16x32xf32, #tpu.memory_space<vmem>>, vector<16x32xf32>
      tpu.vector_store %arg6[%c0_18, %c0_19], %28 {strides = array<i32>} : memref<16x32xf32, #tpu.memory_space<vmem>>, vector<16x32xf32>,
    } else {
    }
    return
  }
  func.func @transform_0(%arg0: i32, %arg1: i32, %arg2: i32) -> (i32, i32) {
    %c0_i32 = arith.constant 0 : i32
    return %arg0, %arg2 : i32, i32
  }
  func.func @transform_1(%arg0: i32, %arg1: i32, %arg2: i32) -> (i32, i32) {
    %c0_i32 = arith.constant 0 : i32
    return %arg2, %arg1 : i32, i32
  }
  func.func @transform_2(%arg0: i32, %arg1: i32, %arg2: i32) -> (i32, i32) {
    %c0_i32 = arith.constant 0 : i32
    %c0_i32_0 = arith.constant 0 : i32
    return %c0_i32, %arg1 : i32, i32
  }
  func.func @transform_3(%arg0: i32, %arg1: i32, %arg2: i32) -> (i32, i32) {
    %c0_i32 = arith.constant 0 : i32
    return %arg0, %arg1 : i32, i32
  }
}

</mosaic_0001>

<bundles_post_ra>
// kernel: block_forward.8
= control target key start
LH: loop header
LB: loop body
LE: loop exit
PB: predicated region body
PF: predicated region fallthrough
CT: control target
= control target key end

     0   :  { %8 = vsyncpa [#allocation4], 0  ;;  %s135_s15 = smov [#allocation3]   ;;  %s136_s17 = smov 128   ;;  %s183_s0 = inlined_call_operand.vmem [shape: f32[16,32], index: 0, kind: input, shape index: {}]   ;;  %s184_s1 = inlined_call_operand.hbm [shape: f32[32,96], index: 1, kind: input, shape index: {}]   ;;  %s185_s2 = inlined_call_operand.vmem [shape: f32[1,96], index: 2, kind: input, shape index: {}]   ;;  %s186_s3 = inlined_call_operand.vmem [shape: f32[16,96], index: 3, kind: output, shape index: {}]  }
   0x1   :  { %s15_s14 = sshll.u32 %s184_s1, 4  ;;  %s17_s16 = sshll.u32 %s135_s15, 4  ;;  %s16_s14 = int_to_ptr.hbm [resolvable:$true] %s15_s14  ;;  %s18_s16 = int_to_ptr.vmem [resolvable:$true] %s17_s16 }
   0x2   :  { %s137_s18 = smov 8  }
   0x3   :  { %23 = dma.hbm_to_vmem [thread:$0]  %s16_s14, 512, %s18_s16, [#allocation4], %s136_s17, %s136_s17, %s137_s18  }
   0x4   :  { %133 = dma.done.wait [#allocation4], 512  }
   0x5   :  { %134 = vsyncadd [#allocation4], 4294966784  ;;  %vm34_vm0 = vcmask 785408   ;;  %v138_v0 = vmov 0.0   ;;  %v44_v1 = vld [vmem:[#allocation3 + $0x18] sm:$0xff]  ;;  %v43_v2 = vld [vmem:[#allocation3 + $0x10] sm:$0xff] }
   0x6   :  { %35 = vst.msk [vmem:[#allocation2] sm:$0xff] %vm34_vm0, %v138_v0  ;;  %64 = vmatpush.msra.mxu0 %v44_v1  ;;  %100 = vmatpush.msra.mxu1 %v44_v1  ;;  %v42_v3 = vld [vmem:[#allocation3 + $0x8] sm:$0xff]  ;;  %v41_v4 = vld [vmem:[#allocation3] sm:$0xff]  ;;  %v39_v5 = vld [vmem:[%s183_s0] sm:$0xff]  ;;  %vm45_vm1 = vcmask 261120  }
   0x7   :  { %36 = vst.msk [vmem:[#allocation2 + $0x8] sm:$0xff] %vm34_vm0, %v138_v0  ;;  %v40_v6 = vld [vmem:[%s183_s0 + $0x8] sm:$0xff]  ;;  %v108_v13 = vld [vmem:[%s185_s2] ss:$0 sm:$0xff] }
   0x8   :  { %65 = vmatpush.msra.mxu0 %v43_v2  ;;  %101 = vmatpush.msra.mxu1 %v43_v2 }
   0xa   :  { %66 = vmatpush.msra.mxu0 %v42_v3  ;;  %102 = vmatpush.msra.mxu1 %v42_v3 }
   0xc   :  { %67 = vmatpush.msra.mxu0 %v41_v4  ;;  %103 = vmatpush.msra.mxu1 %v41_v4 }
   0xd   :  { %98 = vmatmul.msk.f32.vlgmr.msra.gmra.mxu0 %vm45_vm1, %v39_v5  ;;  %99 = vmatmul.msk.f32.vlgmr.msra.gmra.mxu1 %vm45_vm1, %v40_v6  ;;  %v37_v7 = vld [vmem:[#allocation2] sm:$0xff] }
   0xe   :  { %v38_v8 = vld [vmem:[#allocation2 + $0x8] sm:$0xff] }
  0x8a   :  { %v69_v9 = vpop.f32.mrf.mxu0  ;;  %v72_v10 = vpop.f32.mrf.mxu1 }
  0x8b   :  { %v75_v11 = vadd.f32 %v69_v9, %v37_v7  ;;  %v76_v12 = vadd.f32 %v72_v10, %v38_v8 }
  0x8d   :  { %78 = vst.msk [vmem:[#allocation2] sm:$0xff] %vm34_vm0, %v75_v11 }
  0x8e   :  { %79 = vst.msk [vmem:[#allocation2 + $0x8] sm:$0xff] %vm34_vm0, %v76_v12 }
  0x94   :  { %v83_v14 = vld [vmem:[#allocation2] sm:$0xff] }
  0x95   :  { %v89_v15 = vadd.f32 %v108_v13, %v83_v14  ;;  %v84_v16 = vld [vmem:[#allocation2 + $0x8] sm:$0xff] }
  0x96   :  { %v90_v17 = vadd.f32 %v108_v13, %v84_v16 }
  0x97   :  { %91 = vst.msk [vmem:[%s186_s3] sm:$0xff] %vm34_vm0, %v89_v15 }
  0x98   :  { %92 = vst.msk [vmem:[%s186_s3 + $0x8] sm:$0xff] %vm34_vm0, %v90_v17 }
  0x99   :  { %97 = vsyncpa [#allocation4], 1 }

// kernel: block_forward.7
= control target key start
LH: loop header
LB: loop body
LE: loop exit
PB: predicated region body
PF: predicated region fallthrough
CT: control target
= control target key end

     0   :  { %8 = vsyncpa [#allocation3], 0  ;;  %s141_s15 = smov [#allocation2]   ;;  %s142_s17 = smov 128   ;;  %s186_s0 = inlined_call_operand.hbm [shape: f32[16,32], index: 0, kind: input, shape index: {}]   ;;  %s187_s1 = inlined_call_operand.vmem [shape: f32[1,32], index: 1, kind: input, shape index: {}]   ;;  %s188_s2 = inlined_call_operand.vmem [shape: f32[1,32], index: 2, kind: input, shape index: {}]   ;;  %s189_s3 = inlined_call_operand.vmem [shape: f32[16,32], index: 3, kind: output, shape index: {}]  }
   0x1   :  { %s13_s14 = sshll.u32 %s186_s0, 4  ;;  %s15_s16 = sshll.u32 %s141_s15, 4  ;;  %s14_s14 = int_to_ptr.hbm [resolvable:$true] %s13_s14  ;;  %s16_s16 = int_to_ptr.vmem [resolvable:$true] %s15_s16 }
   0x2   :  { %s143_s18 = smov 8  }
   0x3   :  { %21 = dma.hbm_to_vmem [thread:$0]  %s14_s14, 256, %s16_s16, [#allocation3], %s142_s17, %s142_s17, %s143_s18  }
   0x4   :  { %139 = dma.done.wait [#allocation3], 256  }
   0x5   :  { %140 = vsyncadd [#allocation3], 4294967040  ;;  %vm32_vm0 = vcmask 261120   ;;  %v30_v0 = vld [vmem:[#allocation2] sm:$0xff]  ;;  %v31_v2 = vld [vmem:[#allocation2 + $0x8] sm:$0xff]  ;;  %v144_v4 = vmov 32.0  }
   0x6   :  { %v33_v1 = vsel %vm32_vm0, %v30_v0, 0.0  ;;  %v36_v3 = vsel %vm32_vm0, %v31_v2, 0.0  ;;  %109 = vrcp.f32 %v144_v4  ;;  %v107_v35 = vld [vmem:[%s187_s1] ss:$0 sm:$0xff] }
   0x7   :  { %34 = vadd.xlane.f32.xlu0 %v33_v1  ;;  %v108_v38 = vld [vmem:[%s188_s2] ss:$0 sm:$0xff] }
   0xc   :  { %v110_v5 = vpop.eup %109 }
   0xd   :  { %v40_v6 = vmul.f32 32.0, %v110_v5  ;;  %vm44_vm1 = vweird.f32 %v110_v5 }
   0xf   :  { %37 = vadd.xlane.f32.xlu0 %v36_v3  ;;  %v41_v7 = vsub.f32 1.0, %v40_v6 }
  0x11   :  { %v42_v8 = vmul.f32 %v110_v5, %v41_v7 }
  0x13   :  { %v43_v9 = vadd.f32 %v110_v5, %v42_v8 }
  0x15   :  { %v45_v10 = vsel %vm44_vm1, %v110_v5, %v43_v9 }
  0x7a   :  { %v35_v11 = vpop.xlane.xlu0 %34 }
  0x7b   :  { %v46_v12 = vmul.f32 %v45_v10, %v35_v11 }
  0x7d   :  { %v48_v13 = vsub.f32 %v30_v0, %v46_v12 }
  0x7f   :  { %v50_v14 = vmul.f32 %v48_v13, %v48_v13 }
  0x81   :  { %v52_v15 = vsel %vm32_vm0, %v50_v14, 0.0 }
  0x82   :  { %53 = vadd.xlane.f32.xlu1 %v52_v15  ;;  %v38_v16 = vpop.xlane.xlu0 %37 }
  0x83   :  { %v47_v17 = vmul.f32 %v45_v10, %v38_v16 }
  0x85   :  { %v49_v18 = vsub.f32 %v31_v2, %v47_v17 }
  0x87   :  { %v51_v19 = vmul.f32 %v49_v18, %v49_v18 }
  0x89   :  { %v55_v20 = vsel %vm32_vm0, %v51_v19, 0.0 }
  0x8a   :  { %56 = vadd.xlane.f32.xlu1 %v55_v20 }
  0xf5   :  { %v54_v21 = vpop.xlane.xlu1 %53 }
  0xf6   :  { %v58_v22 = vmul.f32 %v54_v21, %v45_v10 }
  0xf8   :  { %v60_v23 = vadd.f32 1e-05, %v58_v22 }
  0xfa   :  { %111 = vrsqrt.f32 %v60_v23  ;;  %vm68_vm3 = vweird.f32 %v60_v23 }
  0xfd   :  { %v57_v24 = vpop.xlane.xlu1 %56 }
  0xfe   :  { %v59_v25 = vmul.f32 %v57_v24, %v45_v10 }
 0x100   :  { %v112_v26 = vpop.eup %111  ;;  %v61_v27 = vadd.f32 1e-05, %v59_v25 }
 0x101   :  { %v63_v28 = vmul.f32 %v112_v26, %v60_v23  ;;  %vm69_vm2 = vweird.f32 %v112_v26 }
 0x102   :  { %113 = vrsqrt.f32 %v61_v27  ;;  %vm70_vm4 = vmor %vm68_vm3, %vm69_vm2  ;;  %vm78_vm6 = vweird.f32 %v61_v27 }
 0x103   :  { %v64_v29 = vmul.f32 %v112_v26, %v63_v28 }
 0x105   :  { %v65_v30 = vmul.f32 0.5, %v64_v29 }
 0x107   :  { %v66_v31 = vsub.f32 1.5, %v65_v30 }
 0x108   :  { %v114_v32 = vpop.eup %113 }
 0x109   :  { %v67_v33 = vmul.f32 %v112_v26, %v66_v31  ;;  %v73_v34 = vmul.f32 %v114_v32, %v61_v27  ;;  %vm79_vm5 = vweird.f32 %v114_v32 }
 0x10a   :  { %vm80_vm7 = vmor %vm78_vm6, %vm79_vm5 }
 0x10b   :  { %v71_v36 = vsel %vm70_vm4, %v112_v26, %v67_v33  ;;  %v74_v37 = vmul.f32 %v114_v32, %v73_v34 }
 0x10c   :  { %v82_v39 = vmul.f32 %v71_v36, %v48_v13 }
 0x10d   :  { %v75_v40 = vmul.f32 0.5, %v74_v37 }
 0x10e   :  { %v88_v41 = vmul.f32 %v107_v35, %v82_v39 }
 0x10f   :  { %v76_v42 = vsub.f32 1.5, %v75_v40 }
 0x110   :  { %v94_v43 = vadd.f32 %v108_v38, %v88_v41 }
 0x111   :  { %v77_v44 = vmul.f32 %v114_v32, %v76_v42 }
 0x112   :  { %96 = vst.msk [vmem:[%s189_s3] sm:$0xff] %vm32_vm0, %v94_v43 }
 0x113   :  { %v81_v45 = vsel %vm80_vm7, %v114_v32, %v77_v44 }
 0x114   :  { %v83_v46 = vmul.f32 %v81_v45, %v49_v18 }
 0x116   :  { %v89_v47 = vmul.f32 %v107_v35, %v83_v46 }
 0x118   :  { %v95_v48 = vadd.f32 %v108_v38, %v89_v47 }
 0x11a   :  { %97 = vst.msk [vmem:[%s189_s3 + $0x8] sm:$0xff] %vm32_vm0, %v95_v48 }
 0x11b   :  { %102 = vsyncpa [#allocation3], 1 }

// kernel: block_forward.9
= control target key start
LH: loop header
LB: loop body
LE: loop exit
PB: predicated region body
PF: predicated region fallthrough
CT: control target
= control target key end

     0   :  { %s593_s12 = smov 0   ;;  %s595_s13 = smov 0   ;;  %s662_s0 = inlined_call_operand.vmem [shape: f32[2,4,8,8], index: 0, kind: input, shape index: {}]   ;;  %s663_s1 = inlined_call_operand.vmem [shape: f32[2,4,8,8], index: 1, kind: input, shape index: {}]   ;;  %s664_s2 = inlined_call_operand.vmem [shape: f32[2,4,8,8], index: 2, kind: input, shape index: {}]   ;;  %s665_s3 = inlined_call_operand.vmem [shape: f32[2,4,8,8], index: 3, kind: output, shape index: {}]  }
   0x1   :  { %s597_s14 = smov 0   ;;  %s599_s15 = smov 0  }
   0x2   :  { %s601_s16 = smov 0  }
   0x3 LB: > { %s22_s17 = sadd.s32 1, %s563_s14  ;;  %s25_s18 = sadd.s32 1, %s567_s15  ;;  %s571_s16 = sphi %s601_s16, %s13_s16   ;;  %s567_s15 = sphi %s599_s15, %s669_s15   ;;  %s563_s14 = sphi %s597_s14, %s668_s14   ;;  %s559_s13 = sphi %s595_s13, %s667_s13   ;;  %s555_s12 = sphi %s593_s12, %s666_s12  }
   0x4   : > { %p23_p0 = scmp.ge.s32.totalorder %s22_s17, 4  ;;  %p475_p1 = scmp.ge.s32.totalorder %s571_s16, 1 }
   0x5   : > { %p186_p2 = scmp.lt.s32.totalorder %s571_s16, 9 }
   0x6   : > { %s671_s17 = smov (%p23_p0, %s22_s17), 0  ;;  %s673_s18 = smov (!%p23_p0, %s25_s18), %s567_s15 }
   0x7   : > { %p187_p3 = pnand %p475_p1, %p186_p2  ;;  %p27_p4 = scmp.ge.s32.totalorder %s673_s18, 2 }
   0x8   : > { %p232_p5 = scmp.lt.s32.totalorder (!%p187_p3), %s559_s13, 1  ;;  %p234_p6 = scmp.lt.s32.totalorder (!%p187_p3), %s555_s12, 3 }
   0x9   : > { %s675_s18 = smov (%p27_p4, %s673_s18), 0  ;;  %190 = sbr.rel (%p187_p3) target bundleno = 543 (0x21f), region = 32 }
   0xe   : > { %s677_s13 = smov (!%p232_p5, %s559_s13), 1  ;;  %s679_s12 = smov (!%p234_p6, %s555_s12), 3  ;;  %vm267_vm0 = vcmask 64512   ;;  %v295_v2 = vlaneseq }
   0xf   : > { %s476_s19 = sshll.u32 %s677_s13, 2 }
  0x10   : > { %s237_s20 = sadd.s32 %s476_s19, %s679_s12  ;;  %v296_v3 = vshrl.u32 %v295_v2, 7  ;;  %v298_v4 = vand.u32 127, %v295_v2 }
  0x11   : > { %s623_s21 = sshll.u32 %s237_s20, 3 }
  0x12   : > { %s247_s24 = scalar_lea.vmem %s663_s1, %s623_s21  ;;  %s239_s27 = scalar_lea.vmem %s662_s0, %s623_s21  ;;  %vm299_vm1 = vcmp.le.s32.totalorder %v298_v4, %v296_v3 }
  0x13   : > { %v265_v0 = vld [vmem:[%s247_s24] sm:$0xff]  ;;  %s255_s30 = scalar_lea.vmem %s664_s2, %s623_s21  ;;  %s263_s6 = scalar_lea.vmem %s665_s3, %s623_s21 }
  0x14   : > { %484 = vmatpush.xpose.msk.msra.mxu0 %vm267_vm0, %v265_v0  ;;  %v264_v1 = vld [vmem:[%s239_s27] sm:$0xff] }
  0x15   : > { %v266_v14 = vld [vmem:[%s255_s30] sm:$0xff] }
  0x16   : > { %343 = vmatpush.msra.mxu1 %v266_v14 }
  0x17   : > { %485 = vmatmul.msk.f32.vlgmr.msra.gmra.mxu0 %vm267_vm0, %v264_v1 }
  0x94   : > { %v291_v5 = vpop.f32.mrf.mxu0 }
  0x95   : > { %v294_v6 = vmul.f32 0.35355338, %v291_v5 }
  0x97   : > { %v300_v7 = vsel %vm299_vm1, %v294_v6, -1e+30 }
  0x98   : > { %v301_v8 = vsel %vm267_vm0, %v300_v7, -inf }
  0x99   : > { %302 = vmax.xlane.f32.xlu0 %v301_v8 }
 0x10c   : > { %v303_v9 = vpop.xlane.xlu0 %302 }
 0x10d   : > { %v304_v10 = vsub.f32 %v300_v7, %v303_v9 }
 0x10f   : > { %v305_v11 = vmul.f32 1.442695, %v304_v10 }
 0x111   : > { %529 = vpow2.f32 %v305_v11 }
 0x117   : > { %v530_v12 = vpop.eup %529 }
 0x118   : > { %v307_v13 = vsel %vm267_vm0, %v530_v12, 0.0 }
 0x119   : > { %308 = vadd.xlane.f32.xlu0 %v307_v13 }
 0x18c   : > { %v309_v15 = vpop.xlane.xlu0 %308 }
 0x18d   : > { %531 = vrcp.f32 %v309_v15  ;;  %v321_v19 = vand.u32 2147483648, %v309_v15  ;;  %v319_v21 = vand.u32 2147483647, %v309_v15  ;;  %vm315_vm3 = vweird.f32 %v309_v15 }
 0x18f   : > { %v322_v23 = vor.u32 1.1754944e-38, %v321_v19  ;;  %vm320_vm5 = vcmp.eq.f32.partialorder %v319_v21, 8.507059e+37 }
 0x193   : > { %v532_v16 = vpop.eup %531 }
 0x194   : > { %v311_v17 = vmul.f32 %v532_v16, %v309_v15  ;;  %vm316_vm2 = vweird.f32 %v532_v16 }
 0x195   : > { %vm317_vm4 = vmor %vm315_vm3, %vm316_vm2 }
 0x196   : > { %v312_v18 = vsub.f32 1.0, %v311_v17 }
 0x198   : > { %v313_v20 = vmul.f32 %v532_v16, %v312_v18 }
 0x19a   : > { %v314_v22 = vadd.f32 %v532_v16, %v313_v20 }
 0x19c   : > { %v318_v24 = vsel %vm317_vm4, %v532_v16, %v314_v22 }
 0x19d   : > { %v323_v25 = vsel %vm320_vm5, %v322_v23, %v318_v24 }
 0x19e   : > { %v324_v26 = vmul.f32 %v530_v12, %v323_v25 }
 0x1a0   : > { %486 = vmatmul.msk.f32.vlgmr.msra.gmra.mxu1 %vm267_vm0, %v324_v26 }
 0x21d   : > { %v345_v27 = vpop.f32.mrf.mxu1 }
 0x21e   : > { %348 = vst.msk [vmem:[%s263_s6] sm:$0xff] %vm267_vm0, %v345_v27 }
 0x21f PF: > { %s13_s16 = sadd.s32 1, %s571_s16   ;;  %s666_s12 = smov %s563_s14 }
 0x220   : > { %p10_p7 = scmp.ge.s32.totalorder %s13_s16, 10   ;;  %s667_s13 = smov %s567_s15 }
 0x221   : > { %s668_s14 = smov %s671_s17  ;;  %s669_s15 = smov %s675_s18 }
 0x222   :  { %12 = sbr.rel (!%p10_p7) target bundleno = 3 (0x3), region = 68 }

// kernel: block_forward.10
= control target key start
LH: loop header
LB: loop body
LE: loop exit
PB: predicated region body
PF: predicated region fallthrough
CT: control target
= control target key end

     0   :  { %vm18_vm0 = vcmask 261120   ;;  %v88_v2 = vmov 0.0   ;;  %s144_s1 = inlined_call_operand.vmem [shape: f32[32,32], index: 1, kind: input, shape index: {}]   ;;  %s145_s2 = inlined_call_operand.vmem [shape: f32[1,32], index: 2, kind: input, shape index: {}]   ;;  %s146_s0 = inlined_call_operand.vmem [shape: f32[16,32], index: 0, kind: input, shape index: {}]   ;;  %s147_s3 = inlined_call_operand.vmem [shape: f32[16,32], index: 3, kind: output, shape index: {}]  }
   0x1   :  { %v28_v0 = vld [vmem:[%s144_s1 + $0x18] sm:$0xff]  ;;  %v27_v1 = vld [vmem:[%s144_s1 + $0x10] sm:$0xff]  ;;  %19 = vst.msk [vmem:[#allocation2] sm:$0xff] %vm18_vm0, %v88_v2  ;;  %v26_v3 = vld [vmem:[%s144_s1 + $0x8] sm:$0xff] }
   0x2   :  { %48 = vmatpush.msra.mxu0 %v28_v0  ;;  %82 = vmatpush.msra.mxu1 %v28_v0  ;;  %20 = vst.msk [vmem:[#allocation2 + $0x8] sm:$0xff] %vm18_vm0, %v88_v2  ;;  %v25_v4 = vld [vmem:[%s144_s1] sm:$0xff]  ;;  %v24_v6 = vld [vmem:[%s146_s0 + $0x8] sm:$0xff] }
   0x3   :  { %v23_v5 = vld [vmem:[%s146_s0] sm:$0xff] }
   0x4   :  { %49 = vmatpush.msra.mxu0 %v27_v1  ;;  %83 = vmatpush.msra.mxu1 %v27_v1  ;;  %v87_v13 = vld [vmem:[%s145_s2] ss:$0 sm:$0xff] }
   0x6   :  { %50 = vmatpush.msra.mxu0 %v26_v3  ;;  %84 = vmatpush.msra.mxu1 %v26_v3 }
   0x8   :  { %51 = vmatpush.msra.mxu0 %v25_v4  ;;  %85 = vmatpush.msra.mxu1 %v25_v4  ;;  %v21_v7 = vld [vmem:[#allocation2] sm:$0xff] }
   0x9   :  { %80 = vmatmul.msk.f32.vlgmr.msra.gmra.mxu0 %vm18_vm0, %v23_v5  ;;  %81 = vmatmul.msk.f32.vlgmr.msra.gmra.mxu1 %vm18_vm0, %v24_v6  ;;  %v22_v8 = vld [vmem:[#allocation2 + $0x8] sm:$0xff] }
  0x86   :  { %v53_v9 = vpop.f32.mrf.mxu0  ;;  %v56_v10 = vpop.f32.mrf.mxu1 }
  0x87   :  { %v59_v11 = vadd.f32 %v53_v9, %v21_v7  ;;  %v60_v12 = vadd.f32 %v56_v10, %v22_v8 }
  0x89   :  { %61 = vst.msk [vmem:[#allocation2] sm:$0xff] %vm18_vm0, %v59_v11 }
  0x8a   :  { %62 = vst.msk [vmem:[#allocation2 + $0x8] sm:$0xff] %vm18_vm0, %v60_v12 }
  0x90   :  { %v66_v14 = vld [vmem:[#allocation2] sm:$0xff] }
  0x91   :  { %v72_v15 = vadd.f32 %v87_v13, %v66_v14  ;;  %v67_v16 = vld [vmem:[#allocation2 + $0x8] sm:$0xff] }
  0x92   :  { %v73_v17 = vadd.f32 %v87_v13, %v67_v16 }
  0x93   :  { %74 = vst.msk [vmem:[%s147_s3] sm:$0xff] %vm18_vm0, %v72_v15 }
  0x94   :  { %75 = vst.msk [vmem:[%s147_s3 + $0x8] sm:$0xff] %vm18_vm0, %v73_v17 }

// kernel: block_forward.12
= control target key start
LH: loop header
LB: loop body
LE: loop exit
PB: predicated region body
PF: predicated region fallthrough
CT: control target
= control target key end

     0   :  { %vm18_vm0 = vcmask 523264   ;;  %v111_v2 = vmov 0.0   ;;  %vm29_vm1 = vcmask 261120   ;;  %s165_s1 = inlined_call_operand.vmem [shape: f32[32,64], index: 1, kind: input, shape index: {}]   ;;  %s166_s2 = inlined_call_operand.vmem [shape: f32[1,64], index: 2, kind: input, shape index: {}]   ;;  %s167_s0 = inlined_call_operand.vmem [shape: f32[16,32], index: 0, kind: input, shape index: {}]   ;;  %s168_s3 = inlined_call_operand.vmem [shape: f32[16,64], index: 3, kind: output, shape index: {}]  }
   0x1   :  { %v28_v0 = vld [vmem:[%s165_s1 + $0x18] sm:$0xff]  ;;  %v27_v1 = vld [vmem:[%s165_s1 + $0x10] sm:$0xff]  ;;  %19 = vst.msk [vmem:[#allocation2] sm:$0xff] %vm18_vm0, %v111_v2  ;;  %v26_v3 = vld [vmem:[%s165_s1 + $0x8] sm:$0xff] }
   0x2   :  { %48 = vmatpush.msra.mxu0 %v28_v0  ;;  %101 = vmatpush.msra.mxu1 %v28_v0  ;;  %20 = vst.msk [vmem:[#allocation2 + $0x8] sm:$0xff] %vm18_vm0, %v111_v2  ;;  %v25_v4 = vld [vmem:[%s165_s1] sm:$0xff]  ;;  %v24_v6 = vld [vmem:[%s167_s0 + $0x8] sm:$0xff] }
   0x3   :  { %v23_v5 = vld [vmem:[%s167_s0] sm:$0xff] }
   0x4   :  { %49 = vmatpush.msra.mxu0 %v27_v1  ;;  %102 = vmatpush.msra.mxu1 %v27_v1  ;;  %v106_v13 = vld [vmem:[%s166_s2] ss:$0 sm:$0xff] }
   0x6   :  { %50 = vmatpush.msra.mxu0 %v26_v3  ;;  %103 = vmatpush.msra.mxu1 %v26_v3 }
   0x8   :  { %51 = vmatpush.msra.mxu0 %v25_v4  ;;  %104 = vmatpush.msra.mxu1 %v25_v4  ;;  %v21_v7 = vld [vmem:[#allocation2] sm:$0xff] }
   0x9   :  { %99 = vmatmul.msk.f32.vlgmr.msra.gmra.mxu0 %vm29_vm1, %v23_v5  ;;  %100 = vmatmul.msk.f32.vlgmr.msra.gmra.mxu1 %vm29_vm1, %v24_v6  ;;  %v22_v8 = vld [vmem:[#allocation2 + $0x8] sm:$0xff] }
  0x86   :  { %v53_v9 = vpop.f32.mrf.mxu0  ;;  %v56_v10 = vpop.f32.mrf.mxu1 }
  0x87   :  { %v59_v11 = vadd.f32 %v53_v9, %v21_v7  ;;  %v60_v12 = vadd.f32 %v56_v10, %v22_v8 }
  0x89   :  { %62 = vst.msk [vmem:[#allocation2] sm:$0xff] %vm18_vm0, %v59_v11 }
  0x8a   :  { %63 = vst.msk [vmem:[#allocation2 + $0x8] sm:$0xff] %vm18_vm0, %v60_v12 }
  0x90   :  { %v67_v14 = vld [vmem:[#allocation2] sm:$0xff] }
  0x91   :  { %v73_v15 = vadd.f32 %v106_v13, %v67_v14  ;;  %v68_v16 = vld [vmem:[#allocation2 + $0x8] sm:$0xff] }
  0x92   :  { %v74_v17 = vadd.f32 %v106_v13, %v68_v16 }
  0x93   :  { %v77_v18 = vmul.f32 %v73_v15, %v73_v15  ;;  %v75_v30 = vmul.f32 0.5, %v73_v15 }
  0x94   :  { %v78_v19 = vmul.f32 %v74_v17, %v74_v17  ;;  %v76_v32 = vmul.f32 0.5, %v74_v17 }
  0x95   :  { %v79_v20 = vmul.f32 %v77_v18, %v73_v15 }
  0x96   :  { %v80_v21 = vmul.f32 %v78_v19, %v74_v17 }
  0x97   :  { %v81_v22 = vmul.f32 0.044715, %v79_v20 }
  0x98   :  { %v82_v23 = vmul.f32 0.044715, %v80_v21 }
  0x99   :  { %v83_v24 = vadd.f32 %v81_v22, %v73_v15 }
  0x9a   :  { %v84_v25 = vadd.f32 %v82_v23, %v74_v17 }
  0x9b   :  { %v85_v26 = vmul.f32 0.7978846, %v83_v24 }
  0x9c   :  { %v86_v27 = vmul.f32 0.7978846, %v84_v25 }
  0x9d   :  { %107 = vtanh.f32 %v85_v26 }
  0x9e   :  { %109 = vtanh.f32 %v86_v27 }
  0xa3   :  { %v108_v28 = vpop.eup %107 }
  0xa4   :  { %v110_v29 = vpop.eup %109  ;;  %v89_v31 = vadd.f32 1.0, %v108_v28 }
  0xa5   :  { %v90_v33 = vadd.f32 1.0, %v110_v29 }
  0xa6   :  { %v91_v34 = vmul.f32 %v89_v31, %v75_v30 }
  0xa7   :  { %v92_v35 = vmul.f32 %v90_v33, %v76_v32 }
  0xa8   :  { %93 = vst.msk [vmem:[%s168_s3] sm:$0xff] %vm18_vm0, %v91_v34 }
  0xa9   :  { %94 = vst.msk [vmem:[%s168_s3 + $0x8] sm:$0xff] %vm18_vm0, %v92_v35 }

// kernel: block_forward.11
= control target key start
LH: loop header
LB: loop body
LE: loop exit
PB: predicated region body
PF: predicated region fallthrough
CT: control target
= control target key end

     0   :  { %vm16_vm0 = vcmask 261120   ;;  %v95_v4 = vmov 32.0   ;;  %s140_s0 = inlined_call_operand.vmem [shape: f32[16,32], index: 0, kind: input, shape index: {}]   ;;  %s141_s1 = inlined_call_operand.vmem [shape: f32[1,32], index: 1, kind: input, shape index: {}]   ;;  %s142_s2 = inlined_call_operand.vmem [shape: f32[1,32], index: 2, kind: input, shape index: {}]   ;;  %s143_s3 = inlined_call_operand.vmem [shape: f32[16,32], index: 3, kind: output, shape index: {}]  }
   0x1   :  { %v14_v0 = vld [vmem:[%s140_s0] sm:$0xff]  ;;  %v15_v2 = vld [vmem:[%s140_s0 + $0x8] sm:$0xff]  ;;  %89 = vrcp.f32 %v95_v4 }
   0x2   :  { %v17_v1 = vsel %vm16_vm0, %v14_v0, 0.0  ;;  %v20_v3 = vsel %vm16_vm0, %v15_v2, 0.0  ;;  %v87_v35 = vld [vmem:[%s141_s1] ss:$0 sm:$0xff] }
   0x3   :  { %18 = vadd.xlane.f32.xlu0 %v17_v1  ;;  %v88_v38 = vld [vmem:[%s142_s2] ss:$0 sm:$0xff] }
   0x7   :  { %v90_v5 = vpop.eup %89 }
   0x8   :  { %v24_v6 = vmul.f32 32.0, %v90_v5  ;;  %vm28_vm1 = vweird.f32 %v90_v5 }
   0xa   :  { %v25_v7 = vsub.f32 1.0, %v24_v6 }
   0xb   :  { %21 = vadd.xlane.f32.xlu0 %v20_v3 }
   0xc   :  { %v26_v8 = vmul.f32 %v90_v5, %v25_v7 }
   0xe   :  { %v27_v9 = vadd.f32 %v90_v5, %v26_v8 }
  0x10   :  { %v29_v10 = vsel %vm28_vm1, %v90_v5, %v27_v9 }
  0x76   :  { %v19_v11 = vpop.xlane.xlu0 %18 }
  0x77   :  { %v30_v12 = vmul.f32 %v29_v10, %v19_v11 }
  0x79   :  { %v32_v13 = vsub.f32 %v14_v0, %v30_v12 }
  0x7b   :  { %v34_v14 = vmul.f32 %v32_v13, %v32_v13 }
  0x7d   :  { %v36_v15 = vsel %vm16_vm0, %v34_v14, 0.0 }
  0x7e   :  { %37 = vadd.xlane.f32.xlu1 %v36_v15  ;;  %v22_v16 = vpop.xlane.xlu0 %21 }
  0x7f   :  { %v31_v17 = vmul.f32 %v29_v10, %v22_v16 }
  0x81   :  { %v33_v18 = vsub.f32 %v15_v2, %v31_v17 }
  0x83   :  { %v35_v19 = vmul.f32 %v33_v18, %v33_v18 }
  0x85   :  { %v39_v20 = vsel %vm16_vm0, %v35_v19, 0.0 }
  0x86   :  { %40 = vadd.xlane.f32.xlu1 %v39_v20 }
  0xf1   :  { %v38_v21 = vpop.xlane.xlu1 %37 }
  0xf2   :  { %v42_v22 = vmul.f32 %v38_v21, %v29_v10 }
  0xf4   :  { %v44_v23 = vadd.f32 1e-05, %v42_v22 }
  0xf6   :  { %91 = vrsqrt.f32 %v44_v23  ;;  %vm52_vm3 = vweird.f32 %v44_v23 }
  0xf9   :  { %v41_v24 = vpop.xlane.xlu1 %40 }
  0xfa   :  { %v43_v25 = vmul.f32 %v41_v24, %v29_v10 }
  0xfc   :  { %v92_v26 = vpop.eup %91  ;;  %v45_v27 = vadd.f32 1e-05, %v43_v25 }
  0xfd   :  { %v47_v28 = vmul.f32 %v92_v26, %v44_v23  ;;  %vm53_vm2 = vweird.f32 %v92_v26 }
  0xfe   :  { %93 = vrsqrt.f32 %v45_v27  ;;  %vm54_vm4 = vmor %vm52_vm3, %vm53_vm2  ;;  %vm62_vm6 = vweird.f32 %v45_v27 }
  0xff   :  { %v48_v29 = vmul.f32 %v92_v26, %v47_v28 }
 0x101   :  { %v49_v30 = vmul.f32 0.5, %v48_v29 }
 0x103   :  { %v50_v31 = vsub.f32 1.5, %v49_v30 }
 0x104   :  { %v94_v32 = vpop.eup %93 }
 0x105   :  { %v51_v33 = vmul.f32 %v92_v26, %v50_v31  ;;  %v57_v34 = vmul.f32 %v94_v32, %v45_v27  ;;  %vm63_vm5 = vweird.f32 %v94_v32 }
 0x106   :  { %vm64_vm7 = vmor %vm62_vm6, %vm63_vm5 }
 0x107   :  { %v55_v36 = vsel %vm54_vm4, %v92_v26, %v51_v33  ;;  %v58_v37 = vmul.f32 %v94_v32, %v57_v34 }
 0x108   :  { %v66_v39 = vmul.f32 %v55_v36, %v32_v13 }
 0x109   :  { %v59_v40 = vmul.f32 0.5, %v58_v37 }
 0x10a   :  { %v72_v41 = vmul.f32 %v87_v35, %v66_v39 }
 0x10b   :  { %v60_v42 = vsub.f32 1.5, %v59_v40 }
 0x10c   :  { %v78_v43 = vadd.f32 %v88_v38, %v72_v41 }
 0x10d   :  { %v61_v44 = vmul.f32 %v94_v32, %v60_v42 }
 0x10e   :  { %80 = vst.msk [vmem:[%s143_s3] sm:$0xff] %vm16_vm0, %v78_v43 }
 0x10f   :  { %v65_v45 = vsel %vm64_vm7, %v94_v32, %v61_v44 }
 0x110   :  { %v67_v46 = vmul.f32 %v65_v45, %v33_v18 }
 0x112   :  { %v73_v47 = vmul.f32 %v87_v35, %v67_v46 }
 0x114   :  { %v79_v48 = vadd.f32 %v88_v38, %v73_v47 }
 0x116   :  { %81 = vst.msk [vmem:[%s143_s3 + $0x8] sm:$0xff] %vm16_vm0, %v79_v48 }

// kernel: block_forward.13
= control target key start
LH: loop header
LB: loop body
LE: loop exit
PB: predicated region body
PF: predicated region fallthrough
CT: control target
= control target key end

     0   :  { %vm18_vm0 = vcmask 261120   ;;  %v119_v2 = vmov 0.0   ;;  %vm33_vm1 = vcmask 523264   ;;  %s185_s1 = inlined_call_operand.vmem [shape: f32[64,32], index: 1, kind: input, shape index: {}]   ;;  %s186_s2 = inlined_call_operand.vmem [shape: f32[1,32], index: 2, kind: input, shape index: {}]   ;;  %s187_s0 = inlined_call_operand.vmem [shape: f32[16,64], index: 0, kind: input, shape index: {}]   ;;  %s188_s3 = inlined_call_operand.vmem [shape: f32[16,32], index: 3, kind: output, shape index: {}]  }
   0x1   :  { %v32_v0 = vld [vmem:[%s185_s1 + $0x38] sm:$0xff]  ;;  %v31_v1 = vld [vmem:[%s185_s1 + $0x30] sm:$0xff]  ;;  %19 = vst.msk [vmem:[#allocation2] sm:$0xff] %vm18_vm0, %v119_v2  ;;  %v30_v3 = vld [vmem:[%s185_s1 + $0x28] sm:$0xff] }
   0x2   :  { %48 = vmatpush.msra.mxu0 %v32_v0  ;;  %105 = vmatpush.msra.mxu1 %v32_v0  ;;  %20 = vst.msk [vmem:[#allocation2 + $0x8] sm:$0xff] %vm18_vm0, %v119_v2  ;;  %v29_v4 = vld [vmem:[%s185_s1 + $0x20] sm:$0xff]  ;;  %v28_v5 = vld [vmem:[%s185_s1 + $0x18] sm:$0xff]  ;;  %v27_v6 = vld [vmem:[%s185_s1 + $0x10] sm:$0xff] }
   0x3   :  { %v26_v7 = vld [vmem:[%s185_s1 + $0x8] sm:$0xff]  ;;  %v25_v8 = vld [vmem:[%s185_s1] sm:$0xff] }
   0x4   :  { %49 = vmatpush.msra.mxu0 %v31_v1  ;;  %106 = vmatpush.msra.mxu1 %v31_v1  ;;  %v23_v9 = vld [vmem:[%s187_s0] sm:$0xff]  ;;  %v24_v10 = vld [vmem:[%s187_s0 + $0x8] sm:$0xff] }
   0x5   :  { %v114_v17 = vld [vmem:[%s186_s2] ss:$0 sm:$0xff] }
   0x6   :  { %50 = vmatpush.msra.mxu0 %v30_v3  ;;  %107 = vmatpush.msra.mxu1 %v30_v3 }
   0x8   :  { %51 = vmatpush.msra.mxu0 %v29_v4  ;;  %108 = vmatpush.msra.mxu1 %v29_v4  ;;  %v21_v11 = vld [vmem:[#allocation2] sm:$0xff] }
   0x9   :  { %v22_v12 = vld [vmem:[#allocation2 + $0x8] sm:$0xff] }
   0xa   :  { %52 = vmatpush.msra.mxu0 %v28_v5  ;;  %109 = vmatpush.msra.mxu1 %v28_v5 }
   0xc   :  { %53 = vmatpush.msra.mxu0 %v27_v6  ;;  %110 = vmatpush.msra.mxu1 %v27_v6 }
   0xe   :  { %54 = vmatpush.msra.mxu0 %v26_v7  ;;  %111 = vmatpush.msra.mxu1 %v26_v7 }
  0x10   :  { %55 = vmatpush.msra.mxu0 %v25_v8  ;;  %112 = vmatpush.msra.mxu1 %v25_v8 }
  0x11   :  { %103 = vmatmul.msk.f32.vlgmr.msra.gmra.mxu0 %vm33_vm1, %v23_v9  ;;  %104 = vmatmul.msk.f32.vlgmr.msra.gmra.mxu1 %vm33_vm1, %v24_v10 }
  0x8e   :  { %v57_v13 = vpop.f32.mrf.mxu0  ;;  %v60_v14 = vpop.f32.mrf.mxu1 }
  0x8f   :  { %v63_v15 = vadd.f32 %v57_v13, %v21_v11  ;;  %v64_v16 = vadd.f32 %v60_v14, %v22_v12 }
  0x91   :  { %66 = vst.msk [vmem:[#allocation2] sm:$0xff] %vm18_vm0, %v63_v15 }
  0x92   :  { %67 = vst.msk [vmem:[#allocation2 + $0x8] sm:$0xff] %vm18_vm0, %v64_v16 }
  0x98   :  { %v71_v18 = vld [vmem:[#allocation2] sm:$0xff] }
  0x99   :  { %v77_v19 = vadd.f32 %v114_v17, %v71_v18  ;;  %v72_v20 = vld [vmem:[#allocation2 + $0x8] sm:$0xff] }
  0x9a   :  { %v78_v21 = vadd.f32 %v114_v17, %v72_v20 }
  0x9b   :  { %v81_v22 = vmul.f32 %v77_v19, %v77_v19  ;;  %v79_v34 = vmul.f32 0.5, %v77_v19 }
  0x9c   :  { %v82_v23 = vmul.f32 %v78_v21, %v78_v21  ;;  %v80_v36 = vmul.f32 0.5, %v78_v21 }
  0x9d   :  { %v83_v24 = vmul.f32 %v81_v22, %v77_v19 }
  0x9e   :  { %v84_v25 = vmul.f32 %v82_v23, %v78_v21 }
  0x9f   :  { %v85_v26 = vmul.f32 0.044715, %v83_v24 }
  0xa0   :  { %v86_v27 = vmul.f32 0.044715, %v84_v25 }
  0xa1   :  { %v87_v28 = vadd.f32 %v85_v26, %v77_v19 }
  0xa2   :  { %v88_v29 = vadd.f32 %v86_v27, %v78_v21 }
  0xa3   :  { %v89_v30 = vmul.f32 0.7978846, %v87_v28 }
  0xa4   :  { %v90_v31 = vmul.f32 0.7978846, %v88_v29 }
  0xa5   :  { %115 = vtanh.f32 %v89_v30 }
  0xa6   :  { %117 = vtanh.f32 %v90_v31 }
  0xab   :  { %v116_v32 = vpop.eup %115 }
  0xac   :  { %v118_v33 = vpop.eup %117  ;;  %v93_v35 = vadd.f32 1.0, %v116_v32 }
  0xad   :  { %v94_v37 = vadd.f32 1.0, %v118_v33 }
  0xae   :  { %v95_v38 = vmul.f32 %v93_v35, %v79_v34 }
  0xaf   :  { %v96_v39 = vmul.f32 %v94_v37, %v80_v36 }
  0xb0   :  { %97 = vst.msk [vmem:[%s188_s3] sm:$0xff] %vm18_vm0, %v95_v38 }
  0xb1   :  { %98 = vst.msk [vmem:[%s188_s3 + $0x8] sm:$0xff] %vm18_vm0, %v96_v39 }

</bundles_post_ra>
